<compile_context>
chip_gen: v7x
topology: tpu7x:2x2x1
jax: 0.10.0
libtpu: 0.0.40
codegen_flags: <defaults>
</compile_context>

<pallas_src>
import functools
import math

import jax
import jax.numpy as jnp
from jax.experimental import pallas as pl
from jax.experimental.pallas import tpu as pltpu


def _ffn_kernel(x_ref, attr_ref, sel_in_ref, sel_mid_ref,
                w1_ref, b1_ref, w2_ref, b2_ref, o_ref):
    """Fused FFN on node blocks packed g-nodes-per-128-lane-row.

    x_ref    : (rows, g*C_in)      packed node features (lane dense)
    attr_ref : (rows, g)           per-node scalar attribute ("1x0e")
    sel_*    : (g, g*C)            one-hot block selectors to expand attr
    w1_ref   : (g*C_in,  g*C_mid)  block-diagonal kron(I_g, W1)
    w2_ref   : (g*C_mid, g*C_out)  block-diagonal kron(I_g, W2)
    b*_ref   : (1, g*C)            biases tiled g times
    o_ref    : (rows, g*C_out)     packed output
    """
    f32 = jnp.float32
    x = x_ref[...].astype(f32)           # keep element-wise math in f32 (v5e)
    a = attr_ref[...].astype(f32)        # (rows, g)
    g = a.shape[1]

    def expand_attr(sel):
        # out[r, j*C + c] = a[r, j]; unrolled broadcast-sum (g vmul + g-1 vadd
        # per vreg) on full-width vregs -- cheap, VPU has slack here.
        out = a[:, 0:1] * sel[0:1, :]
        for j in range(1, g):
            out = out + a[:, j:j + 1] * sel[j:j + 1, :]
        return out

    a_in = expand_attr(sel_in_ref[...].astype(f32))      # (rows, g*C_in)
    a_mid = expand_attr(sel_mid_ref[...].astype(f32))    # (rows, g*C_mid)

    # fctp_1 (rescale folded into W1) + bias, then SwishGate == SiLU.
    h = jnp.dot(x * a_in, w1_ref[...],
                preferred_element_type=f32) + b1_ref[...]
    h = h * jax.nn.sigmoid(h)

    # fctp_2 + bias.
    y = jnp.dot(h * a_mid, w2_ref[...],
                preferred_element_type=f32) + b2_ref[...]

    # TODO(synk): EquivariantDropout(p=0.1) only acts in training mode; the
    # module is evaluated here in eval mode, where it is the identity.
    o_ref[...] = y.astype(o_ref.dtype)


def _pack_group(*channel_counts):
    """Smallest g such that every packed width g*C is a multiple of 128 lanes."""
    g = 1
    for c in channel_counts:
        g = math.lcm(g, 128 // math.gcd(128, c))
    return g


def _choose_tile_rows(n_rows, target_rows):
    """Largest multiple-of-8 divisor of n_rows that is <= target_rows,
    preferring >=2 grid steps so v7x's two TensorCores both get work."""
    divisors = [d for d in range(8, n_rows + 1, 8) if n_rows % d == 0]
    if not divisors:
        return n_rows                       # full-extent block is always legal
    fitting = [d for d in divisors if d <= target_rows]
    tile = max(fitting) if fitting else min(divisors)
    if tile == n_rows and len(divisors) > 1:
        tile = max(d for d in divisors if d < n_rows)
    return tile


@functools.partial(jax.jit, static_argnames=("target_block_nodes",))
def feed_forward_network(x, attr, w1, b1, w2, b2, *, target_block_nodes=2048):
    """y = (SiLU((x*attr) @ W1 + b1) * attr) @ W2 + b2, fused on TPU."""
    n, c_in = x.shape
    c_mid = w1.shape[1]
    c_out = w2.shape[1]
    assert w1.shape == (c_in, c_mid) and w2.shape == (c_mid, c_out)
    assert attr.shape == (n, 1)

    g = _pack_group(c_in, c_out)            # nodes packed per 128-lane row
    assert n % g == 0, f"N={n} must be a multiple of the node pack factor {g}"
    n_rows = n // g

    # Lane-dense slabs: row-major reshapes, bit-identical layout (free).
    x_packed = x.reshape(n_rows, g * c_in)
    attr_packed = attr.reshape(n_rows, g)

    # Block-diagonal weights / tiled biases: one packed matmul computes the g
    # independent per-node matmuls of a row.  Selectors expand each node's
    # scalar attr across that node's channel block inside the kernel.
    w1_bd = jnp.kron(jnp.eye(g, dtype=w1.dtype), w1)        # (g*c_in,  g*c_mid)
    w2_bd = jnp.kron(jnp.eye(g, dtype=w2.dtype), w2)        # (g*c_mid, g*c_out)
    b1_t = jnp.tile(b1.reshape(1, c_mid), (1, g))           # (1, g*c_mid)
    b2_t = jnp.tile(b2.reshape(1, c_out), (1, g))           # (1, g*c_out)
    eye_f32 = jnp.eye(g, dtype=jnp.float32)
    sel_in = jnp.kron(eye_f32, jnp.ones((1, c_in), jnp.float32))    # (g, g*c_in)
    sel_mid = jnp.kron(eye_f32, jnp.ones((1, c_mid), jnp.float32))  # (g, g*c_mid)

    tile_rows = _choose_tile_rows(n_rows, max(8, target_block_nodes // g))
    grid = (n_rows // tile_rows,)

    out_packed = pl.pallas_call(
        _ffn_kernel,
        out_shape=jax.ShapeDtypeStruct((n_rows, g * c_out), x.dtype),
        grid_spec=pltpu.PrefetchScalarGridSpec(
            num_scalar_prefetch=0,
            grid=grid,
            in_specs=[
                pl.BlockSpec((tile_rows, g * c_in), lambda i: (i, 0)),    # x (packed)
                pl.BlockSpec((tile_rows, g), lambda i: (i, 0)),           # attr (packed)
                pl.BlockSpec((g, g * c_in), lambda i: (0, 0)),            # sel_in
                pl.BlockSpec((g, g * c_mid), lambda i: (0, 0)),           # sel_mid
                pl.BlockSpec((g * c_in, g * c_mid), lambda i: (0, 0)),    # W1 block-diag
                pl.BlockSpec((1, g * c_mid), lambda i: (0, 0)),           # b1 tiled
                pl.BlockSpec((g * c_mid, g * c_out), lambda i: (0, 0)),   # W2 block-diag
                pl.BlockSpec((1, g * c_out), lambda i: (0, 0)),           # b2 tiled
            ],
            out_specs=pl.BlockSpec((tile_rows, g * c_out), lambda i: (i, 0)),
        ),
        compiler_params=pltpu.CompilerParams(
            # Node axis is embarrassingly parallel: with >=2 grid steps the two
            # v7x TensorCores each take a share.  Per-step VMEM is ~2-3 MiB,
            # far below every generation's limit, so no vmem_limit_bytes set.
            dimension_semantics=("parallel",)),
    )(x_packed, attr_packed, sel_in, sel_mid, w1_bd, b1_t, w2_bd, b2_t)

    return out_packed.reshape(n, c_out)


def _init_params(key, c_in, c_mid, c_out, dtype=jnp.float32):
    """Deterministic init.  The _RESCALE=True factor is folded into the weights
    (uniform(-1,1)/sqrt(fan_in)); biases start at zero as in Equiformer."""
    k1, k2 = jax.random.split(key)
    w1 = jax.random.uniform(k1, (c_in, c_mid), dtype, -1.0, 1.0) / jnp.sqrt(float(c_in))
    w2 = jax.random.uniform(k2, (c_mid, c_out), dtype, -1.0, 1.0) / jnp.sqrt(float(c_mid))
    b1 = jnp.zeros((1, c_mid), dtype)
    b2 = jnp.zeros((1, c_out), dtype)
    return w1, b1, w2, b2


def _reference(x, attr, w1, b1, w2, b2):
    h = (x * attr) @ w1 + b1
    h = h * jax.nn.sigmoid(h)
    return (h * attr) @ w2 + b2


if __name__ == "__main__":
    key = jax.random.PRNGKey(0)
    kx, ka, kp = jax.random.split(key, 3)

    # Small synthetic graph: 1024 nodes, "32x0e" -> "64x0e" -> "32x0e".
    N, C_IN, C_MID, C_OUT = 1024, 32, 64, 32
    x = jax.random.normal(kx, (N, C_IN), jnp.float32)              # node_input
    attr = jax.random.uniform(ka, (N, 1), jnp.float32, 0.5, 1.5)   # non-trivial node_attr
    w1, b1, w2, b2 = _init_params(kp, C_IN, C_MID, C_OUT)

    out = jax.block_until_ready(feed_forward_network(x, attr, w1, b1, w2, b2))
    ref = _reference(x, attr, w1, b1, w2, b2)
    assert out.shape == (N, C_OUT)
    assert jnp.allclose(out, ref, atol=1e-4, rtol=1e-4), "f32 mismatch vs reference"

    # bf16 storage path: halves the dominant HBM traffic; accumulation stays f32.
    out_bf16 = jax.block_until_ready(
        feed_forward_network(x.astype(jnp.bfloat16), attr,
                             w1.astype(jnp.bfloat16), b1,
                             w2.astype(jnp.bfloat16), b2))
    assert out_bf16.dtype == jnp.bfloat16
    assert jnp.allclose(out_bf16.astype(jnp.float32), ref, atol=5e-2, rtol=5e-2), \
        "bf16 mismatch vs reference"

    print("KERNEL_OK")
</pallas_src>

<mosaic_0001>
module attributes {stable_mosaic.version = 11 : i64} {
  func.func @_ffn_kernel(%arg0: i32, %arg1: memref<128x128xf32, #tpu.memory_space<vmem>>, %arg2: memref<128x4xf32, #tpu.memory_space<vmem>>, %arg3: memref<4x128xf32, #tpu.memory_space<vmem>>, %arg4: memref<4x256xf32, #tpu.memory_space<vmem>>, %arg5: memref<128x256xf32, #tpu.memory_space<vmem>>, %arg6: memref<1x256xf32, #tpu.memory_space<vmem>>, %arg7: memref<256x128xf32, #tpu.memory_space<vmem>>, %arg8: memref<1x128xf32, #tpu.memory_space<vmem>>, %arg9: memref<128x128xf32, #tpu.memory_space<vmem>>) attributes {dimension_semantics = [#tpu.dimension_semantics<parallel>], iteration_bounds = array<i64: 2>, scalar_prefetch = 0 : i64, scratch_operands = 0 : i64, tpu.core_type = #tpu.core_type<tc>, window_params = [{transform_indices = @transform_0, window_bounds = array<i64: 128, 128>}, {transform_indices = @transform_1, window_bounds = array<i64: 128, 4>}, {pipeline_mode = #tpu.pipeline_mode<synchronous>, transform_indices = @transform_2, window_bounds = array<i64: 4, 128>}, {pipeline_mode = #tpu.pipeline_mode<synchronous>, transform_indices = @transform_3, window_bounds = array<i64: 4, 256>}, {pipeline_mode = #tpu.pipeline_mode<synchronous>, transform_indices = @transform_4, window_bounds = array<i64: 128, 256>}, {pipeline_mode = #tpu.pipeline_mode<synchronous>, transform_indices = @transform_5, window_bounds = array<i64: 1, 256>}, {pipeline_mode = #tpu.pipeline_mode<synchronous>, transform_indices = @transform_6, window_bounds = array<i64: 256, 128>}, {pipeline_mode = #tpu.pipeline_mode<synchronous>, transform_indices = @transform_7, window_bounds = array<i64: 1, 128>}, {transform_indices = @transform_8, window_bounds = array<i64: 128, 128>}]} {
    %c0 = arith.constant 0 : index
    %c0_0 = arith.constant 0 : index
    %0 = vector.load %arg1[%c0, %c0_0] : memref<128x128xf32, #tpu.memory_space<vmem>>, vector<128x128xf32>
    %c0_1 = arith.constant 0 : index
    %c0_2 = arith.constant 0 : index
    %1 = vector.load %arg2[%c0_1, %c0_2] : memref<128x4xf32, #tpu.memory_space<vmem>>, vector<128x4xf32>
    %c0_3 = arith.constant 0 : index
    %c0_4 = arith.constant 0 : index
    %2 = vector.load %arg3[%c0_3, %c0_4] : memref<4x128xf32, #tpu.memory_space<vmem>>, vector<4x128xf32>
    %3 = vector.extract_strided_slice %1 {offsets = [0, 0], sizes = [128, 1], strides = [1, 1]} : vector<128x4xf32> to vector<128x1xf32>
    %4 = vector.extract_strided_slice %2 {offsets = [0, 0], sizes = [1, 128], strides = [1, 1]} : vector<4x128xf32> to vector<1x128xf32>
    %5 = vector.broadcast %3 : vector<128x1xf32> to vector<128x128xf32>
    %6 = vector.broadcast %4 : vector<1x128xf32> to vector<128x128xf32>
    %7 = arith.mulf %5, %6 : vector<128x128xf32>
    %8 = vector.extract_strided_slice %1 {offsets = [0, 1], sizes = [128, 1], strides = [1, 1]} : vector<128x4xf32> to vector<128x1xf32>
    %9 = vector.extract_strided_slice %2 {offsets = [1, 0], sizes = [1, 128], strides = [1, 1]} : vector<4x128xf32> to vector<1x128xf32>
    %10 = vector.broadcast %8 : vector<128x1xf32> to vector<128x128xf32>
    %11 = vector.broadcast %9 : vector<1x128xf32> to vector<128x128xf32>
    %12 = arith.mulf %10, %11 : vector<128x128xf32>
    %13 = arith.addf %7, %12 : vector<128x128xf32>
    %14 = vector.extract_strided_slice %1 {offsets = [0, 2], sizes = [128, 1], strides = [1, 1]} : vector<128x4xf32> to vector<128x1xf32>
    %15 = vector.extract_strided_slice %2 {offsets = [2, 0], sizes = [1, 128], strides = [1, 1]} : vector<4x128xf32> to vector<1x128xf32>
    %16 = vector.broadcast %14 : vector<128x1xf32> to vector<128x128xf32>
    %17 = vector.broadcast %15 : vector<1x128xf32> to vector<128x128xf32>
    %18 = arith.mulf %16, %17 : vector<128x128xf32>
    %19 = arith.addf %13, %18 : vector<128x128xf32>
    %20 = vector.extract_strided_slice %1 {offsets = [0, 3], sizes = [128, 1], strides = [1, 1]} : vector<128x4xf32> to vector<128x1xf32>
    %21 = vector.extract_strided_slice %2 {offsets = [3, 0], sizes = [1, 128], strides = [1, 1]} : vector<4x128xf32> to vector<1x128xf32>
    %22 = vector.broadcast %20 : vector<128x1xf32> to vector<128x128xf32>
    %23 = vector.broadcast %21 : vector<1x128xf32> to vector<128x128xf32>
    %24 = arith.mulf %22, %23 : vector<128x128xf32>
    %25 = arith.addf %19, %24 : vector<128x128xf32>
    %c0_5 = arith.constant 0 : index
    %c0_6 = arith.constant 0 : index
    %26 = vector.load %arg4[%c0_5, %c0_6] : memref<4x256xf32, #tpu.memory_space<vmem>>, vector<4x256xf32>
    %27 = vector.extract_strided_slice %1 {offsets = [0, 0], sizes = [128, 1], strides = [1, 1]} : vector<128x4xf32> to vector<128x1xf32>
    %28 = vector.extract_strided_slice %26 {offsets = [0, 0], sizes = [1, 256], strides = [1, 1]} : vector<4x256xf32> to vector<1x256xf32>
    %29 = vector.broadcast %27 : vector<128x1xf32> to vector<128x256xf32>
    %30 = vector.broadcast %28 : vector<1x256xf32> to vector<128x256xf32>
    %31 = arith.mulf %29, %30 : vector<128x256xf32>
    %32 = vector.extract_strided_slice %1 {offsets = [0, 1], sizes = [128, 1], strides = [1, 1]} : vector<128x4xf32> to vector<128x1xf32>
    %33 = vector.extract_strided_slice %26 {offsets = [1, 0], sizes = [1, 256], strides = [1, 1]} : vector<4x256xf32> to vector<1x256xf32>
    %34 = vector.broadcast %32 : vector<128x1xf32> to vector<128x256xf32>
    %35 = vector.broadcast %33 : vector<1x256xf32> to vector<128x256xf32>
    %36 = arith.mulf %34, %35 : vector<128x256xf32>
    %37 = arith.addf %31, %36 : vector<128x256xf32>
    %38 = vector.extract_strided_slice %1 {offsets = [0, 2], sizes = [128, 1], strides = [1, 1]} : vector<128x4xf32> to vector<128x1xf32>
    %39 = vector.extract_strided_slice %26 {offsets = [2, 0], sizes = [1, 256], strides = [1, 1]} : vector<4x256xf32> to vector<1x256xf32>
    %40 = vector.broadcast %38 : vector<128x1xf32> to vector<128x256xf32>
    %41 = vector.broadcast %39 : vector<1x256xf32> to vector<128x256xf32>
    %42 = arith.mulf %40, %41 : vector<128x256xf32>
    %43 = arith.addf %37, %42 : vector<128x256xf32>
    %44 = vector.extract_strided_slice %1 {offsets = [0, 3], sizes = [128, 1], strides = [1, 1]} : vector<128x4xf32> to vector<128x1xf32>
    %45 = vector.extract_strided_slice %26 {offsets = [3, 0], sizes = [1, 256], strides = [1, 1]} : vector<4x256xf32> to vector<1x256xf32>
    %46 = vector.broadcast %44 : vector<128x1xf32> to vector<128x256xf32>
    %47 = vector.broadcast %45 : vector<1x256xf32> to vector<128x256xf32>
    %48 = arith.mulf %46, %47 : vector<128x256xf32>
    %49 = arith.addf %43, %48 : vector<128x256xf32>
    %50 = arith.mulf %0, %25 : vector<128x128xf32>
    %c0_7 = arith.constant 0 : index
    %c0_8 = arith.constant 0 : index
    %51 = vector.load %arg5[%c0_7, %c0_8] : memref<128x256xf32, #tpu.memory_space<vmem>>, vector<128x256xf32>
    %cst = arith.constant dense<0.000000e+00> : vector<128x256xf32>
    %52 = tpu.matmul %50, %51, %cst {dimension_numbers = #tpu.dot_dimension_numbers<[1], [0], [0], [1], [0, 0, 1, 1], [], []>} : vector<128x128xf32>, vector<128x256xf32>, vector<128x256xf32> -> vector<128x256xf32>
    %c0_9 = arith.constant 0 : index
    %c0_10 = arith.constant 0 : index
    %53 = vector.load %arg6[%c0_9, %c0_10] : memref<1x256xf32, #tpu.memory_space<vmem>>, vector<1x256xf32>
    %54 = vector.broadcast %53 : vector<1x256xf32> to vector<128x256xf32>
    %55 = arith.addf %52, %54 : vector<128x256xf32>
    %56 = arith.negf %55 : vector<128x256xf32>
    %57 = math.exp %56 : vector<128x256xf32>
    %cst_11 = arith.constant 1.000000e+00 : f32
    %58 = vector.broadcast %cst_11 : f32 to vector<128x256xf32>
    %59 = arith.addf %58, %57 : vector<128x256xf32>
    %60 = arith.divf %58, %59 : vector<128x256xf32>
    %61 = arith.mulf %55, %60 : vector<128x256xf32>
    %62 = arith.mulf %61, %49 : vector<128x256xf32>
    %c0_12 = arith.constant 0 : index
    %c0_13 = arith.constant 0 : index
    %63 = vector.load %arg7[%c0_12, %c0_13] : memref<256x128xf32, #tpu.memory_space<vmem>>, vector<256x128xf32>
    %cst_14 = arith.constant dense<0.000000e+00> : vector<128x128xf32>
    %64 = tpu.matmul %62, %63, %cst_14 {dimension_numbers = #tpu.dot_dimension_numbers<[1], [0], [0], [1], [0, 0, 1, 1], [], []>} : vector<128x256xf32>, vector<256x128xf32>, vector<128x128xf32> -> vector<128x128xf32>
    %c0_15 = arith.constant 0 : index
    %c0_16 = arith.constant 0 : index
    %65 = vector.load %arg8[%c0_15, %c0_16] : memref<1x128xf32, #tpu.memory_space<vmem>>, vector<1x128xf32>
    %66 = vector.broadcast %65 : vector<1x128xf32> to vector<128x128xf32>
    %67 = arith.addf %64, %66 : vector<128x128xf32>
    %c0_17 = arith.constant 0 : index
    %c0_18 = arith.constant 0 : index
    %68 = vector.load %arg9[%c0_17, %c0_18] : memref<128x128xf32, #tpu.memory_space<vmem>>, vector<128x128xf32>
    tpu.vector_store %arg9[%c0_17, %c0_18], %67 {strides = array<i32>} : memref<128x128xf32, #tpu.memory_space<vmem>>, vector<128x128xf32>,
    return
  }
  func.func @transform_0(%arg0: i32) -> (i32, i32) {
    %c0_i32 = arith.constant 0 : i32
    %c0_i32_0 = arith.constant 0 : i32
    return %arg0, %c0_i32 : i32, i32
  }
  func.func @transform_1(%arg0: i32) -> (i32, i32) {
    %c0_i32 = arith.constant 0 : i32
    %c0_i32_0 = arith.constant 0 : i32
    return %arg0, %c0_i32 : i32, i32
  }
  func.func @transform_2(%arg0: i32) -> (i32, i32) {
    %c0_i32 = arith.constant 0 : i32
    %c0_i32_0 = arith.constant 0 : i32
    %c0_i32_1 = arith.constant 0 : i32
    return %c0_i32, %c0_i32_0 : i32, i32
  }
  func.func @transform_3(%arg0: i32) -> (i32, i32) {
    %c0_i32 = arith.constant 0 : i32
    %c0_i32_0 = arith.constant 0 : i32
    %c0_i32_1 = arith.constant 0 : i32
    return %c0_i32, %c0_i32_0 : i32, i32
  }
  func.func @transform_4(%arg0: i32) -> (i32, i32) {
    %c0_i32 = arith.constant 0 : i32
    %c0_i32_0 = arith.constant 0 : i32
    %c0_i32_1 = arith.constant 0 : i32
    return %c0_i32, %c0_i32_0 : i32, i32
  }
  func.func @transform_5(%arg0: i32) -> (i32, i32) {
    %c0_i32 = arith.constant 0 : i32
    %c0_i32_0 = arith.constant 0 : i32
    %c0_i32_1 = arith.constant 0 : i32
    return %c0_i32, %c0_i32_0 : i32, i32
  }
  func.func @transform_6(%arg0: i32) -> (i32, i32) {
    %c0_i32 = arith.constant 0 : i32
    %c0_i32_0 = arith.constant 0 : i32
    %c0_i32_1 = arith.constant 0 : i32
    return %c0_i32, %c0_i32_0 : i32, i32
  }
  func.func @transform_7(%arg0: i32) -> (i32, i32) {
    %c0_i32 = arith.constant 0 : i32
    %c0_i32_0 = arith.constant 0 : i32
    %c0_i32_1 = arith.constant 0 : i32
    return %c0_i32, %c0_i32_0 : i32, i32
  }
  func.func @transform_8(%arg0: i32) -> (i32, i32) {
    %c0_i32 = arith.constant 0 : i32
    %c0_i32_0 = arith.constant 0 : i32
    return %arg0, %c0_i32 : i32, i32
  }
}

</mosaic_0001>

<bundles_post_ra>
// kernel: feed_forward_network.1
= control target key start
LH: loop header
LB: loop body
LE: loop exit
PB: predicated region body
PF: predicated region fallthrough
CT: control target
= control target key end

     0   :  { %s2246_s27 = smov 0   ;;  %s3138_s0 = inlined_call_operand.vmem [shape: f32[256,128], index: 0, kind: input, shape index: {}]   ;;  %s3139_s1 = inlined_call_operand.vmem [shape: f32[256,4], index: 1, kind: input, shape index: {}]   ;;  %s3140_s2 = inlined_call_operand.vmem [shape: f32[4,128], index: 2, kind: input, shape index: {}]   ;;  %s3141_s3 = inlined_call_operand.vmem [shape: f32[4,256], index: 3, kind: input, shape index: {}]   ;;  %s3142_s4 = inlined_call_operand.vmem [shape: f32[128,256], index: 4, kind: input, shape index: {}]   ;;  %s3143_s5 = inlined_call_operand.vmem [shape: f32[1,256], index: 5, kind: input, shape index: {}]   ;;  %s3144_s6 = inlined_call_operand.vmem [shape: f32[256,128], index: 6, kind: input, shape index: {}]   ;;  %s3145_s7 = inlined_call_operand.vmem [shape: f32[1,128], index: 7, kind: input, shape index: {}]   ;;  %s3146_s8 = inlined_call_operand.vmem [shape: f32[256,128], index: 8, kind: output, shape index: {}]  }
   0x1 LB: > { %s1807_s28 = sadd.s32 4294967295, %s2194_s27   ;;  %p1811_p0 = scmp.ge.s32.totalorder %s2194_s27, 1  ;;  %s2194_s27 = sphi %s2246_s27, %s18_s27  }
   0x2   : > { %p274_p1 = scmp.lt.s32.totalorder %s2194_s27, 3 }
   0x4   : > { %p275_p2 = pnand %p1811_p0, %p274_p1 }
   0x6   : > { %278 = sbr.rel (%p275_p2) target bundleno = 822 (0x336), region = 52 }
   0xd   : > { %s1812_s29 = sshll.u32 %s1807_s28, 4  ;;  %v2196_v0 = vmov 3   ;;  %v2197_v1 = vmov 2   ;;  %v444_v2 = vlaneseq  ;;  %v2261_v4 = vld [vmem:[%s3141_s3] sm:$0xff]  ;;  %v1079_v15 = vld [vmem:[%s3142_s4 + $0x8] sm:$0xff]  ;;  %v1081_v16 = vld [vmem:[%s3142_s4 + $0x18] sm:$0xff] }
   0xe   : > { %2013 = vset.pattern.permute.xlu0 %v2196_v0  ;;  %2010 = vset.pattern.permute.xlu1 %v2197_v1  ;;  %p314_p3 = scmp.lt.s32.totalorder %s1812_s29, 31  ;;  %v1078_v17 = vld [vmem:[%s3142_s4] sm:$0xff]  ;;  %v2198_v18 = vmov 0   ;;  %v1933_v20 = vpack.c.bf16 %v1081_v16, %v1079_v15  ;;  %v1080_v21 = vld [vmem:[%s3142_s4 + $0x10] sm:$0xff]  ;;  %v1083_v23 = vld [vmem:[%s3142_s4 + $0x28] sm:$0xff]  ;;  %v2199_v29 = vmov 1  }
   0xf   : > { %v2256_v3 = vshrl.u32 %v444_v2, 7  ;;  %v1935_v22 = vpack.c.bf16 %v1080_v21, %v1078_v17  ;;  %v1085_v24 = vld [vmem:[%s3142_s4 + $0x38] sm:$0xff]  ;;  %v1082_v26 = vld [vmem:[%s3142_s4 + $0x20] sm:$0xff]  ;;  %v1084_v27 = vld [vmem:[%s3142_s4 + $0x30] sm:$0xff]  ;;  %v3147_v15 = vmov 0.0  }
  0x10   : > { %s3157_s29 = smov (!%p314_p3, %s1812_s29), 31  ;;  %1934 = vmatprep.subr.bf16.mxu0 %v1933_v20  ;;  %v1937_v25 = vpack.c.bf16 %v1085_v24, %v1083_v23  ;;  %v1939_v28 = vpack.c.bf16 %v1084_v27, %v1082_v26  ;;  %v1087_v30 = vld [vmem:[%s3142_s4 + $0x48] sm:$0xff]  ;;  %v1089_v31 = vld [vmem:[%s3142_s4 + $0x58] sm:$0xff]  ;;  %v1086_v34 = vld [vmem:[%s3142_s4 + $0x40] sm:$0xff]  ;;  %1186 = vmatprep.mubr.f32.mxu0 %v3147_v15 }
  0x11   : > { %s2263_s10 = sshll.u32 %s3157_s29, 3  ;;  %v904_v5 = vsub.s32 6, %v2256_v3  ;;  %v2276_v7 = vsub.s32 2, %v2256_v3  ;;  %v986_v9 = vsub.s32 7, %v2256_v3  ;;  %v2292_v13 = vsub.s32 3, %v2256_v3  ;;  %1936 = vmatpush1.bf16.msra.mxu0 %v1935_v22  ;;  %v1088_v35 = vld [vmem:[%s3142_s4 + $0x50] sm:$0xff] }
  0x12   : > { %s2270_s13 = scalar_lea.vmem %s3139_s1, %s2263_s10  ;;  %1938 = vmatprep.subr.bf16.mxu0 %v1937_v25  ;;  %v1941_v33 = vpack.c.bf16 %v1089_v31, %v1087_v30  ;;  %v1943_v36 = vpack.c.bf16 %v1088_v35, %v1086_v34  ;;  %v1091_v37 = vld [vmem:[%s3142_s4 + $0x68] sm:$0xff]  ;;  %v1093_v38 = vld [vmem:[%s3142_s4 + $0x78] sm:$0xff]  ;;  %v1090_v41 = vld [vmem:[%s3142_s4 + $0x60] sm:$0xff]  ;;  %v2484_v24 = vsub.s32 0, %v2256_v3  ;;  %v772_v25 = vsub.s32 4, %v2256_v3  ;;  %s2598_s25 = scalar_lea.vmem %s3138_s0, %s2263_s10 }
  0x13   : > { %v2273_v6 = vld [vmem:[%s2270_s13] sm:$0xff]  ;;  %v905_v8 = vrot.slane %v2261_v4, %v904_v5  ;;  %v2283_v10 = vld [vmem:[%s2270_s13 + $0x18] sm:$0xff]  ;;  %v2289_v12 = vld [vmem:[%s2270_s13 + $0x8] sm:$0xff]  ;;  %v987_v14 = vrot.slane %v2261_v4, %v986_v9  ;;  %v1945_v40 = vpack.c.bf16 %v1093_v38, %v1091_v37  ;;  %v2488_v26 = vsub.s32 1, %v2256_v3  ;;  %s3101_s18 = scalar_lea.vmem %s3146_s8, %s2263_s10 }
  0x14   : > { %665 = vperm.xlu0 %2013, %v2273_v6   ;;  %565 = vperm.xlu1 %2010, %v2273_v6   ;;  %v2336_v32 = vld [vmem:[%s2270_s13 + $0x10] sm:$0xff]  ;;  %v2353_v39 = vld [vmem:[%s2270_s13 + $0x28] sm:$0xff]  ;;  %v1097_v45 = vld [vmem:[%s3142_s4 + $0x98] sm:$0xff]  ;;  %v822_v27 = vsub.s32 5, %v2256_v3  ;;  %v769_v31 = vrot.slane %v2261_v4, %v2484_v24 }
  0x15   : > { %v2286_v11 = vrot.slane %v905_v8, %v2276_v7  ;;  %v2307_v19 = vrot.slane %v987_v14, %v2292_v13  ;;  %1940 = vmatpush1.bf16.msra.mxu0 %v1939_v28  ;;  %v1092_v42 = vld [vmem:[%s3142_s4 + $0x70] sm:$0xff]  ;;  %v1095_v44 = vld [vmem:[%s3142_s4 + $0x88] sm:$0xff]  ;;  %v2370_v46 = vld [vmem:[%s2270_s13 + $0x40] sm:$0xff] }
  0x16   : > { %1942 = vmatprep.subr.bf16.mxu0 %v1941_v33  ;;  %v1947_v43 = vpack.c.bf16 %v1092_v42, %v1090_v41  ;;  %v1949_v47 = vpack.c.bf16 %v1097_v45, %v1095_v44  ;;  %v1094_v48 = vld [vmem:[%s3142_s4 + $0x80] sm:$0xff]  ;;  %v1096_v49 = vld [vmem:[%s3142_s4 + $0x90] sm:$0xff]  ;;  %v1099_v51 = vld [vmem:[%s3142_s4 + $0xa8] sm:$0xff]  ;;  %v819_v33 = vrot.slane %v2261_v4, %v2488_v26  ;;  %v823_v34 = vrot.slane %v2261_v4, %v822_v27 }
  0x17   : > { %v1951_v50 = vpack.c.bf16 %v1096_v49, %v1094_v48  ;;  %v1101_v52 = vld [vmem:[%s3142_s4 + $0xb8] sm:$0xff]  ;;  %v1098_v54 = vld [vmem:[%s3142_s4 + $0xa0] sm:$0xff]  ;;  %v1100_v55 = vld [vmem:[%s3142_s4 + $0xb0] sm:$0xff]  ;;  %v901_v41 = vrot.slane %v2261_v4, %v2276_v7 }
  0x18   : > { %677 = vperm.xlu0 %2013, %v2283_v10   ;;  %2011 = vset.pattern.permute.xlu1 %v2198_v18  ;;  %v1953_v53 = vpack.c.bf16 %v1101_v52, %v1099_v51  ;;  %v1955_v56 = vpack.c.bf16 %v1100_v55, %v1098_v54  ;;  %v1103_v57 = vld [vmem:[%s3142_s4 + $0xc8] sm:$0xff]  ;;  %v1105_v58 = vld [vmem:[%s3142_s4 + $0xd8] sm:$0xff]  ;;  %v1102_v60 = vld [vmem:[%s3142_s4 + $0xc0] sm:$0xff]  ;;  %v2512_v38 = vrot.slane %v819_v33, %v2488_v26 }
  0x19   : > { %371 = vperm.xlu1 %2011, %v2289_v12   ;;  %1944 = vmatpush1.bf16.msra.mxu0 %v1943_v36  ;;  %v1957_v59 = vpack.c.bf16 %v1105_v58, %v1103_v57  ;;  %v1104_v61 = vld [vmem:[%s3142_s4 + $0xd0] sm:$0xff]  ;;  %v1107_v63 = vld [vmem:[%s3142_s4 + $0xe8] sm:$0xff]  ;;  %v1109_v2 = vld [vmem:[%s3142_s4 + $0xf8] sm:$0xff]  ;;  %v2505_v36 = vrot.slane %v769_v31, %v2484_v24  ;;  %v983_v55 = vrot.slane %v2261_v4, %v2292_v13 }
  0x1a   : > { %1946 = vmatprep.subr.bf16.mxu0 %v1945_v40  ;;  %v1959_v62 = vpack.c.bf16 %v1104_v61, %v1102_v60  ;;  %v353_v5 = vld [vmem:[%s2270_s13 + $0x30] sm:$0xff]  ;;  %v1106_v8 = vld [vmem:[%s3142_s4 + $0xe0] sm:$0xff]  ;;  %v356_v14 = vld [vmem:[%s2270_s13 + $0x48] sm:$0xff] }
  0x1b   : > { %v1108_v9 = vld [vmem:[%s3142_s4 + $0xf0] sm:$0xff]  ;;  %v2431_v16 = vld [vmem:[%s2270_s13 + $0x60] sm:$0xff]  ;;  %v354_v21 = vld [vmem:[%s2270_s13 + $0x38] sm:$0xff] }
  0x1c   : > { %2022 = vset.pattern.permute.xlu0 %v2199_v29  ;;  %v351_v17 = vld [vmem:[%s2270_s13 + $0x20] sm:$0xff]  ;;  %v2456_v20 = vld [vmem:[%s2270_s13 + $0x70] sm:$0xff]  ;;  %v2463_v22 = vld [vmem:[%s2270_s13 + $0x78] sm:$0xff] }
  0x1d   : > { %465 = vperm.xlu0 %2022, %v2273_v6   ;;  %2012 = vset.pattern.permute.xlu1 %v2199_v29  ;;  %v357_v23 = vld [vmem:[%s2270_s13 + $0x50] sm:$0xff]  ;;  %v363_v58 = vld [vmem:[%s3140_s2] sm:$0xf] }
  0x1e   : > { %469 = vperm.xlu1 %2012, %v2289_v12   ;;  %1948 = vmatpush1.bf16.msra.mxu0 %v1947_v43 }
  0x1f   : > { %1950 = vmatprep.subr.bf16.mxu0 %v1949_v47 }
  0x21   : > { %473 = vperm.xlu0 %2022, %v2336_v32  }
  0x22   : > { %2014 = vset.pattern.permute.xlu1 %v2197_v1  ;;  %1952 = vmatpush1.bf16.msra.mxu0 %v1951_v50  ;;  %v2528_v50 = vrot.slane %v901_v41, %v2276_v7 }
  0x23   : > { %569 = vperm.xlu1 %2014, %v2289_v12   ;;  %1954 = vmatprep.subr.bf16.mxu0 %v1953_v53 }
  0x25   : > { %485 = vperm.xlu0 %2022, %v2353_v39  }
  0x26   : > { %1956 = vmatpush1.bf16.msra.mxu0 %v1955_v56 }
  0x27   : > { %2015 = vset.pattern.permute.xlu1 %v2198_v18  ;;  %1958 = vmatprep.subr.bf16.mxu0 %v1957_v59 }
  0x28   : > { %376 = vperm.xlu1 %2015, %v2336_v32  }
  0x29   : > { %497 = vperm.xlu0 %2022, %v2370_v46  }
  0x2a   : > { %1960 = vmatpush1.bf16.msra.mxu0 %v1959_v62 }
  0x2c   : > { %2016 = vset.pattern.permute.xlu1 %v2196_v0 }
  0x2d   : > { %2033 = vset.pattern.permute.xlu0 %v2198_v18  ;;  %669 = vperm.xlu1 %2016, %v2289_v12   ;;  %v1963_v12 = vpack.c.bf16 %v1108_v9, %v1106_v8 }
  0x2e   : > { %366 = vperm.xlu0 %2033, %v2273_v6   ;;  %v1961_v6 = vpack.c.bf16 %v1109_v2, %v1107_v63 }
  0x30   : > { %1962 = vmatprep.subr.bf16.mxu0 %v1961_v6  ;;  %v2555_v6 = vrot.slane %v363_v58, %v2488_v26 }
  0x31   : > { %2017 = vset.pattern.permute.xlu1 %v2197_v1  ;;  %1964 = vmatpush1.bf16.msra.mxu0 %v1963_v12  ;;  %v2560_v12 = vrot.slane %v363_v58, %v2484_v24 }
  0x32   : > { %381 = vperm.xlu0 %2033, %v2283_v10   ;;  %573 = vperm.xlu1 %2017, %v2336_v32  }
  0x36   : > { %396 = vperm.xlu0 %2033, %v353_v5   ;;  %2018 = vset.pattern.permute.xlu1 %v2199_v29 }
  0x37   : > { %477 = vperm.xlu1 %2018, %v2283_v10  }
  0x3a   : > { %411 = vperm.xlu0 %2033, %v356_v14  }
  0x3b   : > { %2019 = vset.pattern.permute.xlu1 %v2196_v0 }
  0x3c   : > { %673 = vperm.xlu1 %2019, %v2336_v32   ;;  %v773_v32 = vrot.slane %v2261_v4, %v772_v25  ;;  %v2549_v4 = vrot.slane %v363_v58, %v2276_v7 }
  0x3e   : > { %426 = vperm.xlu0 %2033, %v2431_v16   ;;  %v2508_v37 = vrot.slane %v773_v32, %v2484_v24 }
  0x40   : > { %2020 = vset.pattern.permute.xlu1 %v2198_v18 }
  0x41   : > { %386 = vperm.xlu1 %2020, %v351_v17  }
  0x42   : > { %2044 = vset.pattern.permute.xlu0 %v2197_v1 }
  0x43   : > { %577 = vperm.xlu0 %2044, %v2283_v10   ;;  %v2451_v10 = vld [vmem:[%s2270_s13 + $0x58] sm:$0xff] }
  0x45   : > { %2021 = vset.pattern.permute.xlu1 %v2199_v29 }
  0x46   : > { %481 = vperm.xlu1 %2021, %v351_v17  }
  0x47   : > { %589 = vperm.xlu0 %2044, %v353_v5  }
  0x4a   : > { %2023 = vset.pattern.permute.xlu1 %v2197_v1 }
  0x4b   : > { %581 = vperm.xlu1 %2023, %v351_v17   ;;  %601 = vperm.xlu0 %2044, %v356_v14  }
  0x4f   : > { %2024 = vset.pattern.permute.xlu1 %v2198_v18  ;;  %613 = vperm.xlu0 %2044, %v2431_v16  }
  0x50   : > { %391 = vperm.xlu1 %2024, %v2353_v39  }
  0x53   : > { %2047 = vset.pattern.permute.xlu0 %v2196_v0 }
  0x54   : > { %2025 = vset.pattern.permute.xlu1 %v2196_v0  ;;  %689 = vperm.xlu0 %2047, %v353_v5  }
  0x55   : > { %681 = vperm.xlu1 %2025, %v351_v17  }
  0x58   : > { %701 = vperm.xlu0 %2047, %v356_v14  }
  0x59   : > { %2026 = vset.pattern.permute.xlu1 %v2197_v1 }
  0x5a   : > { %585 = vperm.xlu1 %2026, %v2353_v39  }
  0x5c   : > { %713 = vperm.xlu0 %2047, %v2431_v16  }
  0x5e   : > { %2027 = vset.pattern.permute.xlu1 %v2199_v29 }
  0x5f   : > { %489 = vperm.xlu1 %2027, %v353_v5   ;;  %v2552_v5 = vrot.slane %v983_v55, %v2292_v13 }
  0x60   : > { %2050 = vset.pattern.permute.xlu0 %v2199_v29 }
  0x61   : > { %509 = vperm.xlu0 %2050, %v2451_v10  }
  0x63   : > { %2028 = vset.pattern.permute.xlu1 %v2196_v0 }
  0x64   : > { %685 = vperm.xlu1 %2028, %v2353_v39   ;;  %v2515_v39 = vrot.slane %v823_v34, %v2488_v26 }
  0x65   : > { %521 = vperm.xlu0 %2050, %v2456_v20  }
  0x68   : > { %2029 = vset.pattern.permute.xlu1 %v2198_v18 }
  0x69   : > { %401 = vperm.xlu1 %2029, %v354_v21   ;;  %2055 = vset.pattern.permute.xlu0 %v2198_v18 }
  0x6a   : > { %441 = vperm.xlu0 %2055, %v2463_v22  }
  0x6d   : > { %2030 = vset.pattern.permute.xlu1 %v2199_v29 }
  0x6e   : > { %493 = vperm.xlu1 %2030, %v354_v21   ;;  %2058 = vset.pattern.permute.xlu0 %v2197_v1 }
  0x6f   : > { %625 = vperm.xlu0 %2058, %v2463_v22  }
  0x72   : > { %2031 = vset.pattern.permute.xlu1 %v2197_v1 }
  0x73   : > { %593 = vperm.xlu1 %2031, %v354_v21   ;;  %2059 = vset.pattern.permute.xlu0 %v2196_v0 }
  0x77   : > { %2032 = vset.pattern.permute.xlu1 %v2198_v18 }
  0x78   : > { %406 = vperm.xlu1 %2032, %v2370_v46  }
  0x7c   : > { %2034 = vset.pattern.permute.xlu1 %v2196_v0 }
  0x7d   : > { %693 = vperm.xlu1 %2034, %v354_v21  }
  0x81   : > { %2035 = vset.pattern.permute.xlu1 %v2197_v1 }
  0x82   : > { %597 = vperm.xlu1 %2035, %v2370_v46  }
  0x86   : > { %2036 = vset.pattern.permute.xlu1 %v2199_v29 }
  0x87   : > { %501 = vperm.xlu1 %2036, %v356_v14   ;;  %v2563_v14 = vrot.slane %v363_v58, %v2292_v13 }
  0x8b   : > { %2037 = vset.pattern.permute.xlu1 %v2196_v0 }
  0x8c   : > { %697 = vperm.xlu1 %2037, %v2370_v46  }
  0x90   : > { %2038 = vset.pattern.permute.xlu1 %v2198_v18 }
  0x91   : > { %416 = vperm.xlu1 %2038, %v357_v23  }
  0x93   : > { %v2491_v28 = vpop.permute.xlu1 %565  ;;  %v2493_v30 = vpop.permute.xlu0 %665 }
  0x94   : > { %v632_v25 = vmul.f32 %v2549_v4, %v2491_v28  ;;  %v916_v13 = vmul.f32 %v2528_v50, %v2491_v28  ;;  %v998_v55 = vmul.f32 %v2552_v5, %v2493_v30 }
  0x95   : > { %2039 = vset.pattern.permute.xlu1 %v2199_v29 }
  0x96   : > { %505 = vperm.xlu1 %2039, %v357_v23  }
  0x97   : > { %v2502_v35 = vpop.permute.xlu0 %677 }
  0x98   : > { %v372_v3 = vpop.permute.xlu1 %371 }
  0x99   : > { %v786_v43 = vmul.f32 %v2505_v36, %v372_v3  ;;  %v787_v44 = vmul.f32 %v2508_v37, %v372_v3 }
  0x9a   : > { %2040 = vset.pattern.permute.xlu1 %v2197_v1 }
  0x9b   : > { %605 = vperm.xlu1 %2040, %v357_v23  }
  0x9c   : > { %v466_v40 = vpop.permute.xlu0 %465 }
  0x9d   : > { %v470_v42 = vpop.permute.xlu1 %469  ;;  %v532_v7 = vmul.f32 %v2555_v6, %v466_v40  ;;  %v834_v17 = vmul.f32 %v2512_v38, %v466_v40  ;;  %v835_v21 = vmul.f32 %v2515_v39, %v466_v40 }
  0x9e   : > { %v836_v45 = vmul.f32 %v2512_v38, %v470_v42  ;;  %v837_v46 = vmul.f32 %v2515_v39, %v470_v42  ;;  %v533_v27 = vmul.f32 %v2555_v6, %v470_v42  ;;  %v449_v42 = vmul.f32 %v2560_v12, %v372_v3 }
  0x9f   : > { %2041 = vset.pattern.permute.xlu1 %v2198_v18 }
  0xa0   : > { %v868_v47 = vadd.f32 %v836_v45, %v786_v43  ;;  %v869_v48 = vadd.f32 %v837_v46, %v787_v44  ;;  %421 = vperm.xlu1 %2041, %v2451_v10   ;;  %v2525_v49 = vpop.permute.xlu0 %473  ;;  %v732_v43 = vmul.f32 %v2563_v14, %v2493_v30  ;;  %v549_v58 = vadd.f32 %v533_v27, %v449_v42 }
  0xa1   : > { %v838_v59 = vmul.f32 %v2512_v38, %v2525_v49  ;;  %v839_v60 = vmul.f32 %v2515_v39, %v2525_v49 }
  0xa2   : > { %v570_v51 = vpop.permute.xlu1 %569 }
  0xa3   : > { %v918_v52 = vmul.f32 %v2528_v50, %v570_v51  ;;  %v919_v53 = vmul.f32 %v2286_v11, %v570_v51  ;;  %v633_v46 = vmul.f32 %v2549_v4, %v570_v51 }
  0xa4   : > { %2042 = vset.pattern.permute.xlu1 %v2196_v0  ;;  %v2533_v54 = vpop.permute.xlu0 %485 }
  0xa5   : > { %v950_v56 = vadd.f32 %v918_v52, %v868_v47  ;;  %v951_v57 = vadd.f32 %v919_v53, %v869_v48  ;;  %705 = vperm.xlu1 %2042, %v357_v23   ;;  %v917_v53 = vmul.f32 %v2286_v11, %v2491_v28  ;;  %v999_v28 = vmul.f32 %v2307_v19, %v2493_v30 }
  0xa7   : > { %v377_v61 = vpop.permute.xlu1 %376 }
  0xa8   : > { %v788_v62 = vmul.f32 %v2505_v36, %v377_v61  ;;  %v789_v63 = vmul.f32 %v2508_v37, %v377_v61  ;;  %v2546_v2 = vpop.permute.xlu0 %497 }
  0xa9   : > { %2043 = vset.pattern.permute.xlu1 %v2197_v1 }
  0xaa   : > { %v870_v8 = vadd.f32 %v838_v59, %v788_v62  ;;  %v871_v9 = vadd.f32 %v839_v60, %v789_v63  ;;  %609 = vperm.xlu1 %2043, %v2451_v10   ;;  %v331_v62 = vld [vmem:[%s2598_s25] sm:$0xff]  ;;  %v649_v63 = vadd.f32 %v633_v46, %v549_v58 }
  0xac   : > { %v670_v23 = vpop.permute.xlu1 %669 }
  0xad   : > { %v1000_v31 = vmul.f32 %v2552_v5, %v670_v23  ;;  %v1001_v32 = vmul.f32 %v2307_v19, %v670_v23  ;;  %v367_v33 = vpop.permute.xlu0 %366  ;;  %v733_v59 = vmul.f32 %v2563_v14, %v670_v23 }
  0xae   : > { %v448_v34 = vmul.f32 %v2560_v12, %v367_v33  ;;  %v784_v41 = vmul.f32 %v2505_v36, %v367_v33  ;;  %v785_v40 = vmul.f32 %v2508_v37, %v367_v33  ;;  %2045 = vset.pattern.permute.xlu1 %v2199_v29  ;;  %v450_v33 = vmul.f32 %v2560_v12, %v377_v61 }
  0xaf   : > { %v2582_v44 = vadd.f32 %v1000_v31, %v950_v56  ;;  %v2584_v45 = vadd.f32 %v1001_v32, %v951_v57  ;;  %513 = vperm.xlu1 %2045, %v2431_v16   ;;  %v534_v32 = vmul.f32 %v2555_v6, %v2525_v49 }
  0xb0   : > { %v548_v47 = vadd.f32 %v532_v7, %v448_v34  ;;  %v866_v48 = vadd.f32 %v834_v17, %v784_v41  ;;  %v867_v52 = vadd.f32 %v835_v21, %v785_v40  ;;  %v2616_v34 = vld [vmem:[%s2270_s13 + $0x68] sm:$0xff] }
  0xb1   : > { %v574_v3 = vpop.permute.xlu1 %573  ;;  %v382_v56 = vpop.permute.xlu0 %381  ;;  %v332_v40 = vld [vmem:[%s2598_s25 + $0x8] sm:$0xff] }
  0xb2   : > { %v648_v57 = vadd.f32 %v632_v25, %v548_v47  ;;  %v948_v60 = vadd.f32 %v916_v13, %v866_v48  ;;  %v920_v16 = vmul.f32 %v2528_v50, %v574_v3  ;;  %v921_v51 = vmul.f32 %v2286_v11, %v574_v3 }
  0xb3   : > { %2046 = vset.pattern.permute.xlu1 %v2196_v0  ;;  %v949_v21 = vadd.f32 %v917_v53, %v867_v52  ;;  %v790_v25 = vmul.f32 %v2505_v36, %v382_v56  ;;  %v791_v27 = vmul.f32 %v2508_v37, %v382_v56  ;;  %v634_v42 = vmul.f32 %v2549_v4, %v574_v3 }
  0xb4   : > { %v952_v7 = vadd.f32 %v920_v16, %v870_v8  ;;  %709 = vperm.xlu1 %2046, %v2451_v10   ;;  %v748_v17 = vadd.f32 %v732_v43, %v648_v57  ;;  %v953_v23 = vadd.f32 %v921_v51, %v871_v9  ;;  %v2610_v30 = vadd.f32 %v998_v55, %v948_v60  ;;  %v333_v60 = vld [vmem:[%s2598_s25 + $0x10] sm:$0xff] }
  0xb5   : > { %v2608_v31 = vpop.permute.xlu0 %396  ;;  %v749_v8 = vadd.f32 %v733_v59, %v649_v63  ;;  %v2621_v43 = vadd.f32 %v999_v28, %v949_v21  ;;  %v550_v47 = vadd.f32 %v534_v32, %v450_v33  ;;  %v451_v59 = vmul.f32 %v2560_v12, %v382_v56 }
  0xb6   : > { %v478_v13 = vpop.permute.xlu1 %477  ;;  %v1062_v10 = vmul.f32 %v748_v17, %v331_v62  ;;  %v735_v56 = vmul.f32 %v2563_v14, %v2502_v35  ;;  %v1005_v32 = vmul.f32 %v2307_v19, %v2502_v35  ;;  %v1004_v33 = vmul.f32 %v2552_v5, %v2502_v35 }
  0xb7   : > { %v840_v9 = vmul.f32 %v2512_v38, %v478_v13  ;;  %v841_v41 = vmul.f32 %v2515_v39, %v478_v13  ;;  %v1063_v48 = vmul.f32 %v749_v8, %v332_v40  ;;  %v650_v53 = vadd.f32 %v634_v42, %v550_v47 }
  0xb8   : > { %2048 = vset.pattern.permute.xlu1 %v2198_v18  ;;  %1187 = vmatmul.mubr.f32.vlgmr.msra.gmra.mrb[0].mxu0 %v1062_v10  ;;  %v535_v16 = vmul.f32 %v2555_v6, %v478_v13 }
  0xb9   : > { %v872_v49 = vadd.f32 %v840_v9, %v790_v25  ;;  %v873_v46 = vadd.f32 %v841_v41, %v791_v27  ;;  %431 = vperm.xlu1 %2048, %v2616_v34   ;;  %v2626_v61 = vpop.permute.xlu0 %411  ;;  %1192 = vmatprep.mubr.f32.mxu0 %v3147_v15 }
  0xba   : > { %v551_v21 = vadd.f32 %v535_v16, %v451_v59 }
  0xbb   : > { %v674_v52 = vpop.permute.xlu1 %673 }
  0xbc   : > { %v734_v55 = vmul.f32 %v2563_v14, %v674_v52  ;;  %v1002_v58 = vmul.f32 %v2552_v5, %v674_v52  ;;  %v1003_v3 = vmul.f32 %v2307_v19, %v674_v52  ;;  %1193 = vmatmul.mubr.f32.gmra.mrb[2].mxu0 %v1063_v48  ;;  %v334_v48 = vld [vmem:[%s2598_s25 + $0x18] sm:$0xff] }
  0xbd   : > { %2049 = vset.pattern.permute.xlu1 %v2199_v29  ;;  %v2634_v57 = vpop.permute.xlu0 %426  ;;  %1198 = vmatprep.mubr.f32.mxu0 %v3147_v15 }
  0xbe   : > { %v750_v28 = vadd.f32 %v734_v55, %v650_v53  ;;  %v2639_v51 = vadd.f32 %v1002_v58, %v952_v7  ;;  %v2641_v62 = vadd.f32 %v1003_v3, %v953_v23  ;;  %517 = vperm.xlu1 %2049, %v2616_v34  }
  0xc0   : > { %v387_v63 = vpop.permute.xlu1 %386  ;;  %v1064_v17 = vmul.f32 %v750_v28, %v333_v60  ;;  %v844_v28 = vmul.f32 %v2512_v38, %v2533_v54 }
  0xc1   : > { %v792_v41 = vmul.f32 %v2505_v36, %v387_v63  ;;  %v793_v40 = vmul.f32 %v2508_v37, %v387_v63 }
  0xc2   : > { %v578_v25 = vpop.permute.xlu0 %577  ;;  %2051 = vset.pattern.permute.xlu1 %v2197_v1  ;;  %1199 = vmatmul.mubr.f32.gmra.mrb[4].mxu0 %v1064_v17  ;;  %v845_v17 = vmul.f32 %v2515_v39, %v2533_v54 }
  0xc3   : > { %v635_v27 = vmul.f32 %v2549_v4, %v578_v25  ;;  %v922_v7 = vmul.f32 %v2528_v50, %v578_v25  ;;  %v923_v23 = vmul.f32 %v2286_v11, %v578_v25  ;;  %617 = vperm.xlu1 %2051, %v2616_v34   ;;  %1204 = vmatprep.mubr.f32.mxu0 %v3147_v15 }
  0xc5   : > { %v651_v8 = vadd.f32 %v635_v27, %v551_v21  ;;  %v954_v13 = vadd.f32 %v922_v7, %v872_v49  ;;  %v955_v10 = vadd.f32 %v923_v23, %v873_v46  ;;  %v482_v9 = vpop.permute.xlu1 %481  ;;  %v452_v7 = vmul.f32 %v2560_v12, %v387_v63  ;;  %v335_v63 = vld [vmem:[%s2598_s25 + $0x20] sm:$0xff] }
  0xc6   : > { %v842_v42 = vmul.f32 %v2512_v38, %v482_v9  ;;  %v843_v47 = vmul.f32 %v2515_v39, %v482_v9  ;;  %v590_v60 = vpop.permute.xlu0 %589 }
  0xc7   : > { %2052 = vset.pattern.permute.xlu1 %v2198_v18  ;;  %v751_v52 = vadd.f32 %v735_v56, %v651_v8  ;;  %v2663_v35 = vadd.f32 %v1005_v32, %v955_v10  ;;  %v2665_v46 = vadd.f32 %v1004_v33, %v954_v13  ;;  %v536_v56 = vmul.f32 %v2555_v6, %v482_v9 }
  0xc8   : > { %v874_v53 = vadd.f32 %v842_v42, %v792_v41  ;;  %v875_v55 = vadd.f32 %v843_v47, %v793_v40  ;;  %436 = vperm.xlu1 %2052, %v2456_v20  }
  0xc9   : > { %v1065_v49 = vmul.f32 %v751_v52, %v334_v48  ;;  %v552_v8 = vadd.f32 %v536_v56, %v452_v7 }
  0xca   : > { %v582_v58 = vpop.permute.xlu1 %581 }
  0xcb   : > { %v924_v3 = vmul.f32 %v2528_v50, %v582_v58  ;;  %v925_v59 = vmul.f32 %v2286_v11, %v582_v58  ;;  %1205 = vmatmul.mubr.f32.gmra.mrb[6].mxu0 %v1065_v49  ;;  %v636_v23 = vmul.f32 %v2549_v4, %v582_v58  ;;  %v537_v58 = vmul.f32 %v2555_v6, %v2533_v54 }
  0xcc   : > { %2053 = vset.pattern.permute.xlu1 %v2196_v0  ;;  %1210 = vmatprep.mubr.f32.mxu0 %v3147_v15  ;;  %v797_v54 = vmul.f32 %v2508_v37, %v2608_v31 }
  0xcd   : > { %v956_v18 = vadd.f32 %v924_v3, %v874_v53  ;;  %v957_v16 = vadd.f32 %v925_v59, %v875_v55  ;;  %717 = vperm.xlu1 %2053, %v2616_v34   ;;  %v2682_v34 = vpop.permute.xlu0 %601  ;;  %v652_v10 = vadd.f32 %v636_v23, %v552_v8  ;;  %v638_v23 = vmul.f32 %v2549_v4, %v590_v60 }
  0xcf   : > { %v392_v21 = vpop.permute.xlu1 %391 }
  0xd0   : > { %v794_v25 = vmul.f32 %v2505_v36, %v392_v21  ;;  %v795_v27 = vmul.f32 %v2508_v37, %v392_v21 }
  0xd1   : > { %2054 = vset.pattern.permute.xlu1 %v2197_v1  ;;  %v2695_v48 = vpop.permute.xlu0 %613 }
  0xd2   : > { %v876_v32 = vadd.f32 %v844_v28, %v794_v25  ;;  %v877_v33 = vadd.f32 %v845_v17, %v795_v27  ;;  %621 = vperm.xlu1 %2054, %v2456_v20   ;;  %v929_v17 = vmul.f32 %v2286_v11, %v590_v60 }
  0xd4   : > { %v682_v13 = vpop.permute.xlu1 %681 }
  0xd5   : > { %v736_v9 = vmul.f32 %v2563_v14, %v682_v13  ;;  %v1006_v41 = vmul.f32 %v2552_v5, %v682_v13  ;;  %v1007_v40 = vmul.f32 %v2307_v19, %v682_v13  ;;  %v690_v28 = vpop.permute.xlu0 %689 }
  0xd6   : > { %2056 = vset.pattern.permute.xlu1 %v2199_v29  ;;  %v453_v29 = vmul.f32 %v2560_v12, %v392_v21  ;;  %v1011_v13 = vmul.f32 %v2307_v19, %v690_v28 }
  0xd7   : > { %v752_v42 = vadd.f32 %v736_v9, %v652_v10  ;;  %v2690_v1 = vadd.f32 %v1006_v41, %v956_v18  ;;  %v2692_v47 = vadd.f32 %v1007_v40, %v957_v16  ;;  %525 = vperm.xlu1 %2056, %v2463_v22   ;;  %v454_v18 = vmul.f32 %v2560_v12, %v2608_v31 }
  0xd8   : > { %v796_v16 = vmul.f32 %v2505_v36, %v2608_v31  ;;  %v553_v7 = vadd.f32 %v537_v58, %v453_v29  ;;  %v1010_v31 = vmul.f32 %v2552_v5, %v690_v28  ;;  %v738_v9 = vmul.f32 %v2563_v14, %v690_v28 }
  0xd9   : > { %v586_v52 = vpop.permute.xlu1 %585  ;;  %v1066_v53 = vmul.f32 %v752_v42, %v335_v63 }
  0xda   : > { %v926_v55 = vmul.f32 %v2528_v50, %v586_v52  ;;  %v927_v49 = vmul.f32 %v2286_v11, %v586_v52  ;;  %v637_v21 = vmul.f32 %v2549_v4, %v586_v52 }
  0xdb   : > { %2057 = vset.pattern.permute.xlu1 %v2196_v0  ;;  %1211 = vmatmul.mubr.f32.gmra.mrb[8].mxu0 %v1066_v53  ;;  %v928_v0 = vmul.f32 %v2528_v50, %v590_v60 }
  0xdc   : > { %v958_v3 = vadd.f32 %v926_v55, %v876_v32  ;;  %v959_v59 = vadd.f32 %v927_v49, %v877_v33  ;;  %721 = vperm.xlu1 %2057, %v2456_v20   ;;  %1216 = vmatprep.mubr.f32.mxu0 %v3147_v15  ;;  %v653_v10 = vadd.f32 %v637_v21, %v553_v7  ;;  %v336_v49 = vld [vmem:[%s2598_s25 + $0x28] sm:$0xff] }
  0xde   : > { %v490_v56 = vpop.permute.xlu1 %489 }
  0xdf   : > { %v538_v20 = vmul.f32 %v2555_v6, %v490_v56  ;;  %v846_v25 = vmul.f32 %v2512_v38, %v490_v56  ;;  %v847_v27 = vmul.f32 %v2515_v39, %v490_v56 }
  0xe0   : > { %725 = vperm.xlu1 %2057, %v2463_v22  }
  0xe1   : > { %v554_v32 = vadd.f32 %v538_v20, %v454_v18  ;;  %v878_v33 = vadd.f32 %v846_v25, %v796_v16  ;;  %v879_v8 = vadd.f32 %v847_v27, %v797_v54 }
  0xe3   : > { %v960_v41 = vadd.f32 %v928_v0, %v878_v33  ;;  %v961_v40 = vadd.f32 %v929_v17, %v879_v8  ;;  %v686_v63 = vpop.permute.xlu1 %685  ;;  %v654_v42 = vadd.f32 %v638_v23, %v554_v32  ;;  %v337_v0 = vld [vmem:[%s2598_s25 + $0x30] sm:$0xff]  ;;  %v850_v8 = vmul.f32 %v2512_v38, %v2546_v2 }
  0xe4   : > { %v737_v60 = vmul.f32 %v2563_v14, %v686_v63  ;;  %v1008_v22 = vmul.f32 %v2552_v5, %v686_v63  ;;  %v1009_v52 = vmul.f32 %v2307_v19, %v686_v63 }
  0xe5   : > { %v2725_v53 = vadd.f32 %v1010_v31, %v960_v41  ;;  %v2727_v55 = vadd.f32 %v1011_v13, %v961_v40  ;;  %v754_v16 = vadd.f32 %v738_v9, %v654_v42  ;;  %v851_v13 = vmul.f32 %v2515_v39, %v2546_v2 }
  0xe6   : > { %v753_v58 = vadd.f32 %v737_v60, %v653_v10  ;;  %v2730_v29 = vadd.f32 %v1008_v22, %v958_v3  ;;  %v2732_v18 = vadd.f32 %v1009_v52, %v959_v59 }
  0xe7   : > { %v1068_v17 = vmul.f32 %v754_v16, %v337_v0 }
  0xe8   : > { %v402_v54 = vpop.permute.xlu1 %401  ;;  %v1067_v28 = vmul.f32 %v753_v58, %v336_v49 }
  0xe9   : > { %v798_v21 = vmul.f32 %v2505_v36, %v402_v54  ;;  %v799_v20 = vmul.f32 %v2508_v37, %v402_v54  ;;  %v455_v63 = vmul.f32 %v2560_v12, %v402_v54 }
  0xea   : > { %1217 = vmatmul.mubr.f32.gmra.mrb[10].mxu0 %v1067_v28 }
  0xeb   : > { %1222 = vmatprep.mubr.f32.mxu0 %v3147_v15 }
  0xed   : > { %v494_v56 = vpop.permute.xlu1 %493 }
  0xee   : > { %v848_v25 = vmul.f32 %v2512_v38, %v494_v56  ;;  %v849_v3 = vmul.f32 %v2515_v39, %v494_v56  ;;  %1223 = vmatmul.mubr.f32.gmra.mrb[12].mxu0 %v1068_v17  ;;  %v539_v10 = vmul.f32 %v2555_v6, %v494_v56  ;;  %v338_v17 = vld [vmem:[%s2598_s25 + $0x38] sm:$0xff] }
  0xef   : > { %1228 = vmatprep.mubr.f32.mxu0 %v3147_v15 }
  0xf0   : > { %v880_v59 = vadd.f32 %v848_v25, %v798_v21  ;;  %v881_v27 = vadd.f32 %v849_v3, %v799_v20  ;;  %v555_v52 = vadd.f32 %v539_v10, %v455_v63  ;;  %v934_v10 = vmul.f32 %v2528_v50, %v2682_v34 }
  0xf2   : > { %v594_v7 = vpop.permute.xlu1 %593 }
  0xf3   : > { %v930_v23 = vmul.f32 %v2528_v50, %v594_v7  ;;  %v931_v31 = vmul.f32 %v2286_v11, %v594_v7  ;;  %v639_v42 = vmul.f32 %v2549_v4, %v594_v7 }
  0xf5   : > { %v962_v32 = vadd.f32 %v930_v23, %v880_v59  ;;  %v963_v33 = vadd.f32 %v931_v31, %v881_v27  ;;  %v655_v58 = vadd.f32 %v639_v42, %v555_v52  ;;  %v540_v27 = vmul.f32 %v2555_v6, %v2546_v2 }
  0xf6   : > { %v457_v31 = vmul.f32 %v2560_v12, %v2626_v61  ;;  %v935_v2 = vmul.f32 %v2286_v11, %v2682_v34 }
  0xf7   : > { %v407_v9 = vpop.permute.xlu1 %406 }
  0xf8   : > { %v800_v41 = vmul.f32 %v2505_v36, %v407_v9  ;;  %v801_v40 = vmul.f32 %v2508_v37, %v407_v9 }
  0xfa   : > { %v882_v60 = vadd.f32 %v850_v8, %v800_v41  ;;  %v883_v22 = vadd.f32 %v851_v13, %v801_v40  ;;  %v456_v8 = vmul.f32 %v2560_v12, %v407_v9  ;;  %v702_v13 = vpop.permute.xlu0 %701 }
  0xfb   : > { %v1016_v9 = vmul.f32 %v2552_v5, %v702_v13 }
  0xfc   : > { %v694_v49 = vpop.permute.xlu1 %693  ;;  %v556_v52 = vadd.f32 %v540_v27, %v456_v8  ;;  %v1555_v27 = vld [vmem:[%s3144_s6 + $0x80] sm:$0xff] }
  0xfd   : > { %v739_v16 = vmul.f32 %v2563_v14, %v694_v49  ;;  %v1012_v28 = vmul.f32 %v2552_v5, %v694_v49  ;;  %v1013_v0 = vmul.f32 %v2307_v19, %v694_v49  ;;  %v339_v8 = vld [vmem:[%s2598_s25 + $0x40] sm:$0xff] }
  0xff   : > { %v755_v56 = vadd.f32 %v739_v16, %v655_v58  ;;  %v2756_v21 = vadd.f32 %v1012_v28, %v962_v32  ;;  %v2758_v20 = vadd.f32 %v1013_v0, %v963_v33  ;;  %v802_v32 = vmul.f32 %v2505_v36, %v2626_v61 }
 0x100   : > { %v803_v33 = vmul.f32 %v2508_v37, %v2626_v61  ;;  %v641_v61 = vmul.f32 %v2549_v4, %v2682_v34  ;;  %v741_v0 = vmul.f32 %v2563_v14, %v702_v13 }
 0x101   : > { %v598_v54 = vpop.permute.xlu1 %597  ;;  %v1069_v25 = vmul.f32 %v755_v56, %v338_v17 }
 0x102   : > { %v932_v3 = vmul.f32 %v2528_v50, %v598_v54  ;;  %v933_v59 = vmul.f32 %v2286_v11, %v598_v54  ;;  %v640_v40 = vmul.f32 %v2549_v4, %v598_v54 }
 0x103   : > { %1229 = vmatmul.mubr.f32.gmra.mrb[14].mxu0 %v1069_v25 }
 0x104   : > { %v964_v7 = vadd.f32 %v932_v3, %v882_v60  ;;  %v965_v23 = vadd.f32 %v933_v59, %v883_v22  ;;  %1234 = vmatprep.mubr.f32.mxu0 %v3147_v15  ;;  %v1017_v22 = vmul.f32 %v2307_v19, %v702_v13  ;;  %v656_v28 = vadd.f32 %v640_v40, %v556_v52  ;;  %v1558_v52 = vld [vmem:[%s3144_s6 + $0x98] sm:$0xff] }
 0x106   : > { %v502_v41 = vpop.permute.xlu1 %501 }
 0x107   : > { %v541_v63 = vmul.f32 %v2555_v6, %v502_v41  ;;  %v852_v42 = vmul.f32 %v2512_v38, %v502_v41  ;;  %v853_v60 = vmul.f32 %v2515_v39, %v502_v41 }
 0x109   : > { %v557_v49 = vadd.f32 %v541_v63, %v457_v31  ;;  %v884_v58 = vadd.f32 %v852_v42, %v802_v32  ;;  %v885_v16 = vadd.f32 %v853_v60, %v803_v33  ;;  %v1556_v31 = vld [vmem:[%s3144_s6 + $0x88] sm:$0xff] }
 0x10a   : > { %v1965_v13 = vpack.c.bf16 %v1556_v31, %v1555_v27 }
 0x10b   : > { %v966_v17 = vadd.f32 %v934_v10, %v884_v58  ;;  %v967_v56 = vadd.f32 %v935_v2, %v885_v16  ;;  %v698_v54 = vpop.permute.xlu1 %697  ;;  %v657_v25 = vadd.f32 %v641_v61, %v557_v49  ;;  %v1539_v10 = vld [vmem:[%s3144_s6] sm:$0xff]  ;;  %v1540_v2 = vld [vmem:[%s3144_s6 + $0x8] sm:$0xff] }
 0x10c   : > { %v740_v3 = vmul.f32 %v2563_v14, %v698_v54  ;;  %v1014_v34 = vmul.f32 %v2552_v5, %v698_v54  ;;  %v1015_v59 = vmul.f32 %v2307_v19, %v698_v54  ;;  %v1967_v42 = vpack.c.bf16 %v1540_v2, %v1539_v10  ;;  %1966 = vmatprep.subr.bf16.mxu1 %v1965_v13  ;;  %v340_v49 = vld [vmem:[%s2598_s25 + $0x48] sm:$0xff] }
 0x10d   : > { %v2794_v32 = vadd.f32 %v1016_v9, %v966_v17  ;;  %v2796_v33 = vadd.f32 %v1017_v22, %v967_v56  ;;  %v757_v60 = vadd.f32 %v741_v0, %v657_v25  ;;  %v1557_v22 = vld [vmem:[%s3144_s6 + $0x90] sm:$0xff]  ;;  %v1559_v0 = vld [vmem:[%s3144_s6 + $0xa0] sm:$0xff]  ;;  %v1560_v17 = vld [vmem:[%s3144_s6 + $0xa8] sm:$0xff]  ;;  %v2830_v25 = vpop.permute.xlu0 %713 }
 0x10e   : > { %v756_v41 = vadd.f32 %v740_v3, %v656_v28  ;;  %v2805_v40 = vadd.f32 %v1014_v34, %v964_v7  ;;  %v2807_v63 = vadd.f32 %v1015_v59, %v965_v23  ;;  %1968 = vmatpush3.bf16.msra.mxu1 %v1967_v42  ;;  %v1969_v58 = vpack.c.bf16 %v1558_v52, %v1557_v22  ;;  %v1541_v7 = vld [vmem:[%s3144_s6 + $0x10] sm:$0xff]  ;;  %v1542_v23 = vld [vmem:[%s3144_s6 + $0x18] sm:$0xff]  ;;  %v1543_v34 = vld [vmem:[%s3144_s6 + $0x20] sm:$0xff] }
 0x10f   : > { %3149 = vst [vmem:[#allocation2_spill] sm:$0xff] %v2796_v33  ;;  %v1971_v16 = vpack.c.bf16 %v1542_v23, %v1541_v7  ;;  %v1071_v28 = vmul.f32 %v757_v60, %v340_v49  ;;  %v1973_v3 = vpack.c.bf16 %v1560_v17, %v1559_v0  ;;  %v1544_v59 = vld [vmem:[%s3144_s6 + $0x28] sm:$0xff]  ;;  %v1562_v42 = vld [vmem:[%s3144_s6 + $0xb8] sm:$0xff] }
 0x110   : > { %v417_v61 = vpop.permute.xlu1 %416  ;;  %v1070_v9 = vmul.f32 %v756_v41, %v339_v8  ;;  %1970 = vmatprep.subr.bf16.mxu1 %v1969_v58  ;;  %v1975_v13 = vpack.c.bf16 %v1544_v59, %v1543_v34  ;;  %v1561_v41 = vld [vmem:[%s3144_s6 + $0xb0] sm:$0xff]  ;;  %v1546_v22 = vld [vmem:[%s3144_s6 + $0x38] sm:$0xff]  ;;  %v1548_v34 = vld [vmem:[%s3144_s6 + $0x48] sm:$0xff] }
 0x111   : > { %v804_v56 = vmul.f32 %v2505_v36, %v417_v61  ;;  %v805_v27 = vmul.f32 %v2508_v37, %v417_v61  ;;  %v1977_v60 = vpack.c.bf16 %v1562_v42, %v1561_v41  ;;  %v2856_v23 = vpop.permute.xlu0 %509  ;;  %v342_v33 = vld [vmem:[%s2598_s25 + $0x58] sm:$0xff] }
 0x112   : > { %1235 = vmatmul.mubr.f32.gmra.mrb[16].mxu0 %v1070_v9  ;;  %1972 = vmatpush3.bf16.msra.mxu1 %v1971_v16  ;;  %v1545_v9 = vld [vmem:[%s3144_s6 + $0x30] sm:$0xff]  ;;  %v1563_v16 = vld [vmem:[%s3144_s6 + $0xc0] sm:$0xff] }
 0x113   : > { %1240 = vmatprep.mubr.f32.mxu0 %v3147_v15  ;;  %1974 = vmatprep.subr.bf16.mxu1 %v1973_v3  ;;  %v1979_v49 = vpack.c.bf16 %v1546_v22, %v1545_v9  ;;  %v1547_v3 = vld [vmem:[%s3144_s6 + $0x40] sm:$0xff]  ;;  %v1550_v22 = vld [vmem:[%s3144_s6 + $0x58] sm:$0xff] }
 0x115   : > { %v506_v54 = vpop.permute.xlu1 %505 }
 0x116   : > { %v854_v31 = vmul.f32 %v2512_v38, %v506_v54  ;;  %v855_v8 = vmul.f32 %v2515_v39, %v506_v54  ;;  %1241 = vmatmul.mubr.f32.gmra.mrb[18].mxu0 %v1071_v28  ;;  %1976 = vmatpush3.bf16.msra.mxu1 %v1975_v13  ;;  %v1564_v28 = vld [vmem:[%s3144_s6 + $0xc8] sm:$0xff]  ;;  %v542_v59 = vmul.f32 %v2555_v6, %v506_v54  ;;  %v1565_v54 = vld [vmem:[%s3144_s6 + $0xd0] sm:$0xff] }
 0x117   : > { %1246 = vmatprep.mubr.f32.mxu0 %v3147_v15  ;;  %1978 = vmatprep.subr.bf16.mxu1 %v1977_v60  ;;  %v1566_v60 = vld [vmem:[%s3144_s6 + $0xd8] sm:$0xff] }
 0x118   : > { %v886_v10 = vadd.f32 %v854_v31, %v804_v56  ;;  %v887_v2 = vadd.f32 %v855_v8, %v805_v27  ;;  %v1981_v56 = vpack.c.bf16 %v1564_v28, %v1563_v16  ;;  %v856_v27 = vmul.f32 %v2512_v38, %v2856_v23 }
 0x119   : > { %v857_v31 = vmul.f32 %v2515_v39, %v2856_v23  ;;  %v1983_v8 = vpack.c.bf16 %v1548_v34, %v1547_v3  ;;  %v1985_v9 = vpack.c.bf16 %v1566_v60, %v1565_v54  ;;  %v1568_v3 = vld [vmem:[%s3144_s6 + $0xe8] sm:$0xff] }
 0x11a   : > { %v606_v52 = vpop.permute.xlu1 %605  ;;  %1980 = vmatpush3.bf16.msra.mxu1 %v1979_v49 }
 0x11b   : > { %v936_v58 = vmul.f32 %v2528_v50, %v606_v52  ;;  %v937_v7 = vmul.f32 %v2286_v11, %v606_v52  ;;  %1982 = vmatprep.subr.bf16.mxu1 %v1981_v56  ;;  %v1567_v56 = vld [vmem:[%s3144_s6 + $0xe0] sm:$0xff] }
 0x11d   : > { %v968_v0 = vadd.f32 %v936_v58, %v886_v10  ;;  %v969_v17 = vadd.f32 %v937_v7, %v887_v2  ;;  %v458_v10 = vmul.f32 %v2560_v12, %v417_v61  ;;  %v642_v2 = vmul.f32 %v2549_v4, %v606_v52  ;;  %v1549_v61 = vld [vmem:[%s3144_s6 + $0x50] sm:$0xff] }
 0x11e   : > { %1984 = vmatpush3.bf16.msra.mxu1 %v1983_v8  ;;  %v1987_v7 = vpack.c.bf16 %v1550_v22, %v1549_v61  ;;  %v1551_v8 = vld [vmem:[%s3144_s6 + $0x60] sm:$0xff]  ;;  %v1570_v61 = vld [vmem:[%s3144_s6 + $0xf8] sm:$0xff] }
 0x11f   : > { %v422_v13 = vpop.permute.xlu1 %421  ;;  %v558_v52 = vadd.f32 %v542_v59, %v458_v10  ;;  %1986 = vmatprep.subr.bf16.mxu1 %v1985_v9  ;;  %v1552_v10 = vld [vmem:[%s3144_s6 + $0x68] sm:$0xff]  ;;  %v1569_v9 = vld [vmem:[%s3144_s6 + $0xf0] sm:$0xff] }
 0x120   : > { %v806_v41 = vmul.f32 %v2505_v36, %v422_v13  ;;  %v807_v42 = vmul.f32 %v2508_v37, %v422_v13 }
 0x121   : > { %v658_v16 = vadd.f32 %v642_v2, %v558_v52  ;;  %v341_v2 = vld [vmem:[%s2598_s25 + $0x50] sm:$0xff] }
 0x122   : > { %v888_v49 = vadd.f32 %v856_v27, %v806_v41  ;;  %v889_v58 = vadd.f32 %v857_v31, %v807_v42  ;;  %1988 = vmatpush3.bf16.msra.mxu1 %v1987_v7  ;;  %v1989_v31 = vpack.c.bf16 %v1568_v3, %v1567_v56  ;;  %v1991_v41 = vpack.c.bf16 %v1552_v10, %v1551_v8 }
 0x123   : > { %v1993_v7 = vpack.c.bf16 %v1570_v61, %v1569_v9  ;;  %v543_v8 = vmul.f32 %v2555_v6, %v2856_v23  ;;  %v459_v10 = vmul.f32 %v2560_v12, %v422_v13  ;;  %v940_v9 = vmul.f32 %v2528_v50, %v2695_v48 }
 0x124   : > { %v706_v28 = vpop.permute.xlu1 %705  ;;  %1990 = vmatprep.subr.bf16.mxu1 %v1989_v31  ;;  %v809_v31 = vmul.f32 %v2508_v37, %v2634_v57  ;;  %v1022_v23 = vmul.f32 %v2552_v5, %v2830_v25  ;;  %v1023_v61 = vmul.f32 %v2307_v19, %v2830_v25 }
 0x125   : > { %v742_v34 = vmul.f32 %v2563_v14, %v706_v28  ;;  %v1018_v59 = vmul.f32 %v2552_v5, %v706_v28  ;;  %v1019_v27 = vmul.f32 %v2307_v19, %v706_v28 }
 0x126   : > { %1992 = vmatpush3.bf16.msra.mxu1 %v1991_v41 }
 0x127   : > { %v758_v42 = vadd.f32 %v742_v34, %v658_v16  ;;  %v2907_v54 = vadd.f32 %v1018_v59, %v968_v0  ;;  %v2909_v60 = vadd.f32 %v1019_v27, %v969_v17  ;;  %v1553_v0 = vld [vmem:[%s3144_s6 + $0x70] sm:$0xff]  ;;  %v1554_v17 = vld [vmem:[%s3144_s6 + $0x78] sm:$0xff]  ;;  %1994 = vmatprep.subr.bf16.mxu1 %v1993_v7  ;;  %v460_v59 = vmul.f32 %v2560_v12, %v2634_v57 }
 0x128   : > { %v1995_v56 = vpack.c.bf16 %v1554_v17, %v1553_v0  ;;  %v808_v27 = vmul.f32 %v2505_v36, %v2634_v57  ;;  %v941_v57 = vmul.f32 %v2286_v11, %v2695_v48  ;;  %v559_v17 = vadd.f32 %v543_v8, %v459_v10 }
 0x129   : > { %3150 = vst [vmem:[#allocation3_spill] sm:$0xff] %v2907_v54  ;;  %3151 = vst [vmem:[#allocation4_spill] sm:$0xff] %v2909_v60  ;;  %v610_v22 = vpop.permute.xlu1 %609  ;;  %v1072_v52 = vmul.f32 %v758_v42, %v341_v2 }
 0x12a   : > { %v938_v16 = vmul.f32 %v2528_v50, %v610_v22  ;;  %v939_v28 = vmul.f32 %v2286_v11, %v610_v22  ;;  %1996 = vmatpush3.bf16.msra.mxu1 %v1995_v56  ;;  %v643_v13 = vmul.f32 %v2549_v4, %v610_v22 }
 0x12b   : > { %1247 = vmatmul.mubr.f32.gmra.mrb[20].mxu0 %v1072_v52 }
 0x12c   : > { %v970_v3 = vadd.f32 %v938_v16, %v888_v49  ;;  %v971_v34 = vadd.f32 %v939_v28, %v889_v58  ;;  %1252 = vmatprep.mubr.f32.mxu0 %v3147_v15  ;;  %v644_v49 = vmul.f32 %v2549_v4, %v2695_v48  ;;  %v744_v16 = vmul.f32 %v2563_v14, %v2830_v25 }
 0x12d   : > { %v659_v15 = vadd.f32 %v643_v13, %v559_v17 }
 0x12e   : > { %v514_v2 = vpop.permute.xlu1 %513 }
 0x12f   : > { %v544_v58 = vmul.f32 %v2555_v6, %v514_v2  ;;  %v858_v41 = vmul.f32 %v2512_v38, %v514_v2  ;;  %v859_v42 = vmul.f32 %v2515_v39, %v514_v2 }
 0x131   : > { %v560_v52 = vadd.f32 %v544_v58, %v460_v59  ;;  %v890_v7 = vadd.f32 %v858_v41, %v808_v27  ;;  %v891_v0 = vadd.f32 %v859_v42, %v809_v31  ;;  %v343_v41 = vld [vmem:[%s2598_s25 + $0x60] sm:$0xff]  ;;  %v3152_v42 = vmov 0.0  }
 0x133   : > { %v660_v28 = vadd.f32 %v644_v49, %v560_v52  ;;  %v972_v56 = vadd.f32 %v940_v9, %v890_v7  ;;  %v973_v48 = vadd.f32 %v941_v57, %v891_v0  ;;  %v710_v2 = vpop.permute.xlu1 %709  ;;  %v522_v52 = vpop.permute.xlu0 %521 }
 0x134   : > { %v743_v60 = vmul.f32 %v2563_v14, %v710_v2  ;;  %v1020_v22 = vmul.f32 %v2552_v5, %v710_v2  ;;  %v1021_v54 = vmul.f32 %v2307_v19, %v710_v2  ;;  %v862_v17 = vmul.f32 %v2512_v38, %v522_v52 }
 0x135   : > { %v2955_v59 = vadd.f32 %v1023_v61, %v973_v48  ;;  %v2957_v27 = vadd.f32 %v1022_v23, %v972_v56  ;;  %v760_v58 = vadd.f32 %v744_v16, %v660_v28  ;;  %v863_v16 = vmul.f32 %v2515_v39, %v522_v52 }
 0x136   : > { %v759_v31 = vadd.f32 %v743_v60, %v659_v15  ;;  %v2959_v8 = vadd.f32 %v1020_v22, %v970_v3  ;;  %v2961_v25 = vadd.f32 %v1021_v54, %v971_v34 }
 0x137   : > { %v1074_v9 = vmul.f32 %v760_v58, %v343_v41 }
 0x138   : > { %v432_v10 = vpop.permute.xlu1 %431  ;;  %v1073_v49 = vmul.f32 %v759_v31, %v342_v33 }
 0x139   : > { %v810_v13 = vmul.f32 %v2505_v36, %v432_v10  ;;  %v811_v61 = vmul.f32 %v2508_v37, %v432_v10  ;;  %v461_v22 = vmul.f32 %v2560_v12, %v432_v10 }
 0x13a   : > { %1253 = vmatmul.mubr.f32.gmra.mrb[22].mxu0 %v1073_v49 }
 0x13b   : > { %1258 = vmatprep.mubr.f32.mxu0 %v3152_v42 }
 0x13d   : > { %v518_v57 = vpop.permute.xlu1 %517 }
 0x13e   : > { %v860_v23 = vmul.f32 %v2512_v38, %v518_v57  ;;  %v861_v15 = vmul.f32 %v2515_v39, %v518_v57  ;;  %1259 = vmatmul.mubr.f32.gmra.mrb[24].mxu0 %v1074_v9  ;;  %v545_v28 = vmul.f32 %v2555_v6, %v518_v57 }
 0x13f   : > { %1264 = vmatprep.mubr.f32.mxu0 %v3152_v42 }
 0x140   : > { %v892_v54 = vadd.f32 %v860_v23, %v810_v13  ;;  %v893_v33 = vadd.f32 %v861_v15, %v811_v61  ;;  %v561_v41 = vadd.f32 %v545_v28, %v461_v22  ;;  %v442_v15 = vpop.permute.xlu0 %441 }
 0x141   : > { %v814_v22 = vmul.f32 %v2505_v36, %v442_v15 }
 0x142   : > { %v618_v60 = vpop.permute.xlu1 %617 }
 0x143   : > { %v942_v3 = vmul.f32 %v2528_v50, %v618_v60  ;;  %v943_v34 = vmul.f32 %v2286_v11, %v618_v60  ;;  %v645_v31 = vmul.f32 %v2549_v4, %v618_v60 }
 0x144   : > { %v626_v28 = vpop.permute.xlu0 %625 }
 0x145   : > { %v974_v7 = vadd.f32 %v942_v3, %v892_v54  ;;  %v975_v0 = vadd.f32 %v943_v34, %v893_v33  ;;  %v661_v13 = vadd.f32 %v645_v31, %v561_v41  ;;  %v344_v54 = vld [vmem:[%s2598_s25 + $0x68] sm:$0xff]  ;;  %v815_v31 = vmul.f32 %v2508_v37, %v442_v15 }
 0x146   : > { %v463_v41 = vmul.f32 %v2560_v12, %v442_v15 }
 0x147   : > { %v437_v56 = vpop.permute.xlu1 %436 }
 0x148   : > { %v812_v48 = vmul.f32 %v2505_v36, %v437_v56  ;;  %v813_v2 = vmul.f32 %v2508_v37, %v437_v56  ;;  %v947_v36 = vmul.f32 %v2286_v11, %v626_v28 }
 0x14a   : > { %v894_v49 = vadd.f32 %v862_v17, %v812_v48  ;;  %v895_v58 = vadd.f32 %v863_v16, %v813_v2 }
 0x14c   : > { %v718_v9 = vpop.permute.xlu1 %717 }
 0x14d   : > { %v745_v61 = vmul.f32 %v2563_v14, %v718_v9  ;;  %v1024_v23 = vmul.f32 %v2552_v5, %v718_v9  ;;  %v1025_v57 = vmul.f32 %v2307_v19, %v718_v9 }
 0x14f   : > { %v761_v33 = vadd.f32 %v745_v61, %v661_v13  ;;  %v2983_v3 = vadd.f32 %v1024_v23, %v974_v7  ;;  %v2985_v34 = vadd.f32 %v1025_v57, %v975_v0  ;;  %v546_v7 = vmul.f32 %v2555_v6, %v522_v52 }
 0x150   : > { %v462_v0 = vmul.f32 %v2560_v12, %v437_v56  ;;  %v946_v13 = vmul.f32 %v2528_v50, %v626_v28  ;;  %v647_v12 = vmul.f32 %v2549_v4, %v626_v28 }
 0x151   : > { %v622_v10 = vpop.permute.xlu1 %621  ;;  %v1075_v60 = vmul.f32 %v761_v33, %v344_v54 }
 0x152   : > { %v944_v17 = vmul.f32 %v2528_v50, %v622_v10  ;;  %v945_v16 = vmul.f32 %v2286_v11, %v622_v10  ;;  %v646_v37 = vmul.f32 %v2549_v4, %v622_v10  ;;  %v562_v57 = vadd.f32 %v546_v7, %v462_v0  ;;  %v345_v11 = vld [vmem:[%s2598_s25 + $0x70] sm:$0xff]  ;;  %v346_v0 = vld [vmem:[%s2598_s25 + $0x78] sm:$0xff] }
 0x153   : > { %1265 = vmatmul.mubr.f32.gmra.mrb[26].mxu0 %v1075_v60 }
 0x154   : > { %v976_v48 = vadd.f32 %v944_v17, %v894_v49  ;;  %v977_v2 = vadd.f32 %v945_v16, %v895_v58  ;;  %1270 = vmatprep.mubr.f32.mxu0 %v3152_v42 }
 0x156   : > { %v526_v9 = vpop.permute.xlu1 %525 }
 0x157   : > { %v547_v61 = vmul.f32 %v2555_v6, %v526_v9  ;;  %v864_v49 = vmul.f32 %v2512_v38, %v526_v9  ;;  %v865_v58 = vmul.f32 %v2515_v39, %v526_v9  ;;  %v662_v6 = vadd.f32 %v646_v37, %v562_v57 }
 0x159   : > { %v896_v23 = vadd.f32 %v864_v49, %v814_v22  ;;  %v897_v52 = vadd.f32 %v865_v58, %v815_v31  ;;  %v563_v56 = vadd.f32 %v547_v61, %v463_v41 }
 0x15b   : > { %v978_v15 = vadd.f32 %v946_v13, %v896_v23  ;;  %v979_v54 = vadd.f32 %v947_v36, %v897_v52  ;;  %v722_v50 = vpop.permute.xlu1 %721  ;;  %v663_v16 = vadd.f32 %v647_v12, %v563_v56 }
 0x15c   : > { %v746_v38 = vmul.f32 %v2563_v14, %v722_v50  ;;  %v1026_v33 = vmul.f32 %v2552_v5, %v722_v50  ;;  %v1027_v39 = vmul.f32 %v2307_v19, %v722_v50 }
 0x15e   : > { %v762_v60 = vadd.f32 %v746_v38, %v662_v6  ;;  %v3006_v10 = vadd.f32 %v1026_v33, %v976_v48  ;;  %v3008_v17 = vadd.f32 %v1027_v39, %v977_v2 }
 0x15f   : > { %v726_v22 = vpop.permute.xlu1 %725 }
 0x160   : > { %v747_v4 = vmul.f32 %v2563_v14, %v726_v22  ;;  %v1028_v28 = vmul.f32 %v2552_v5, %v726_v22  ;;  %v1029_v31 = vmul.f32 %v2307_v19, %v726_v22  ;;  %v1076_v7 = vmul.f32 %v762_v60, %v345_v11  ;;  %v1110_v14 = vld [vmem:[%s3143_s5] sm:$0x3] }
 0x161   : > { %v3023_v5 = vrot.slane %v1110_v14, %v2484_v24  ;;  %v3026_v19 = vrot.slane %v1110_v14, %v2488_v26 }
 0x162   : > { %v763_v41 = vadd.f32 %v747_v4, %v663_v16  ;;  %v3014_v9 = vadd.f32 %v1028_v28, %v978_v15  ;;  %v3016_v13 = vadd.f32 %v1029_v31, %v979_v54  ;;  %1271 = vmatmul.mubr.f32.gmra.mrb[28].mxu0 %v1076_v7 }
 0x163   : > { %1276 = vmatprep.mubr.f32.mxu0 %v3152_v42 }
 0x164   : > { %v1077_v48 = vmul.f32 %v763_v41, %v346_v0 }
 0x166   : > { %1277 = vmatmul.mubr.f32.gmra.mrb[30].mxu0 %v1077_v48 }
 0x18b   : > { %v1188_v2 = vpop.f32.mrb[0].mxu0 }
 0x18c   : > { %v1189_v61 = vadd.f32 %v1188_v2, %v3023_v5  ;;  %v1190_v49 = vpop.f32.mrb[1].mxu0 }
 0x18d   : > { %v1191_v58 = vadd.f32 %v1190_v49, %v3026_v19 }
 0x18e   : > { %v1818_v36 = vmul.f32 -1.442695, %v1189_v61 }
 0x18f   : > { %v1819_v42 = vmul.f32 -1.442695, %v1191_v58  ;;  %v1194_v37 = vpop.f32.mrb[2].mxu0 }
 0x190   : > { %2060 = vpow2.f32 %v1818_v36  ;;  %v1195_v23 = vadd.f32 %v1194_v37, %v3023_v5  ;;  %v1196_v52 = vpop.f32.mrb[3].mxu0 }
 0x191   : > { %2062 = vpow2.f32 %v1819_v42  ;;  %v1197_v24 = vadd.f32 %v1196_v52, %v3026_v19 }
 0x192   : > { %v1820_v57 = vmul.f32 -1.442695, %v1195_v23 }
 0x193   : > { %v1821_v56 = vmul.f32 -1.442695, %v1197_v24 }
 0x194   : > { %2064 = vpow2.f32 %v1820_v57 }
 0x195   : > { %2066 = vpow2.f32 %v1821_v56  ;;  %v1200_v26 = vpop.f32.mrb[4].mxu0 }
 0x196   : > { %v1201_v12 = vadd.f32 %v1200_v26, %v3023_v5  ;;  %v1202_v15 = vpop.f32.mrb[5].mxu0 }
 0x197   : > { %v1203_v54 = vadd.f32 %v1202_v15, %v3026_v19 }
 0x198   : > { %v1822_v50 = vmul.f32 -1.442695, %v1201_v12 }
 0x199   : > { %v1823_v6 = vmul.f32 -1.442695, %v1203_v54 }
 0x19a   : > { %v2061_v38 = vpop.eup %2060  ;;  %2068 = vpow2.f32 %v1822_v50 }
 0x19b   : > { %v2063_v33 = vpop.eup %2062  ;;  %v1379_v39 = vadd.f32 1.0, %v2061_v38  ;;  %2070 = vpow2.f32 %v1823_v6 }
 0x19c   : > { %v1380_v11 = vadd.f32 1.0, %v2063_v33 }
 0x19d   : > { %2072 = vrcp.f32 %v1379_v39 }
 0x19e   : > { %v2065_v60 = vpop.eup %2064  ;;  %2074 = vrcp.f32 %v1380_v11  ;;  %v1206_v16 = vpop.f32.mrb[6].mxu0 }
 0x19f   : > { %v2067_v22 = vpop.eup %2066  ;;  %v1381_v4 = vadd.f32 1.0, %v2065_v60  ;;  %v1207_v28 = vadd.f32 %v1206_v16, %v3023_v5  ;;  %v1208_v31 = vpop.f32.mrb[7].mxu0 }
 0x1a0   : > { %v1382_v7 = vadd.f32 1.0, %v2067_v22  ;;  %v1209_v0 = vadd.f32 %v1208_v31, %v3026_v19 }
 0x1a1   : > { %2076 = vrcp.f32 %v1381_v4  ;;  %v1824_v41 = vmul.f32 -1.442695, %v1207_v28 }
 0x1a2   : > { %2078 = vrcp.f32 %v1382_v7  ;;  %v1825_v48 = vmul.f32 -1.442695, %v1209_v0 }
 0x1a3   : > { %2080 = vpow2.f32 %v1824_v41 }
 0x1a4   : > { %v2069_v14 = vpop.eup %2068  ;;  %2082 = vpow2.f32 %v1825_v48 }
 0x1a5   : > { %v2071_v2 = vpop.eup %2070  ;;  %v1383_v49 = vadd.f32 1.0, %v2069_v14 }
 0x1a6   : > { %v1384_v36 = vadd.f32 1.0, %v2071_v2 }
 0x1a7   : > { %v2073_v42 = vpop.eup %2072  ;;  %2084 = vrcp.f32 %v1383_v49 }
 0x1a8   : > { %v2075_v37 = vpop.eup %2074  ;;  %v1475_v52 = vmul.f32 %v2073_v42, %v1189_v61  ;;  %2086 = vrcp.f32 %v1384_v36 }
 0x1a9   : > { %v1476_v57 = vmul.f32 %v2075_v37, %v1191_v58 }
 0x1aa   : > { %v1507_v56 = vmul.f32 %v1475_v52, %v2610_v30 }
 0x1ab   : > { %v2077_v26 = vpop.eup %2076  ;;  %v1508_v15 = vmul.f32 %v1476_v57, %v2621_v43 }
 0x1ac   : > { %v2079_v50 = vpop.eup %2078  ;;  %v1477_v6 = vmul.f32 %v2077_v26, %v1195_v23 }
 0x1ad   : > { %v2081_v38 = vpop.eup %2080  ;;  %v1478_v33 = vmul.f32 %v2079_v50, %v1197_v24  ;;  %1642 = vmatprep.mubr.f32.mxu1 %v1508_v15 }
 0x1ae   : > { %v2083_v39 = vpop.eup %2082  ;;  %v1385_v11 = vadd.f32 1.0, %v2081_v38  ;;  %v1212_v60 = vpop.f32.mrb[8].mxu0  ;;  %1643 = vmatmul.mubr.f32.vlgmr.msra.gmra.mrb[0].mxu1 %v1507_v56  ;;  %v1509_v16 = vmul.f32 %v1477_v6, %v2582_v44 }
 0x1af   : > { %v1386_v22 = vadd.f32 1.0, %v2083_v39  ;;  %v1213_v61 = vadd.f32 %v1212_v60, %v3023_v5  ;;  %v1214_v58 = vpop.f32.mrb[9].mxu0  ;;  %v1510_v30 = vmul.f32 %v1478_v33, %v2584_v45 }
 0x1b0   : > { %2088 = vrcp.f32 %v1385_v11  ;;  %v1215_v43 = vadd.f32 %v1214_v58, %v3026_v19 }
 0x1b1   : > { %v2085_v4 = vpop.eup %2084  ;;  %2090 = vrcp.f32 %v1386_v22  ;;  %v1826_v23 = vmul.f32 -1.442695, %v1213_v61  ;;  %1647 = vmatprep.mubr.f32.mxu1 %v1510_v30 }
 0x1b2   : > { %v2087_v24 = vpop.eup %2086  ;;  %v1479_v31 = vmul.f32 %v2085_v4, %v1201_v12  ;;  %v1827_v7 = vmul.f32 -1.442695, %v1215_v43  ;;  %1648 = vmatmul.mubr.f32.gmra.mrb[2].mxu1 %v1509_v16 }
 0x1b3   : > { %v1480_v41 = vmul.f32 %v2087_v24, %v1203_v54  ;;  %2092 = vpow2.f32 %v1826_v23 }
 0x1b4   : > { %2094 = vpow2.f32 %v1827_v7  ;;  %v1511_v44 = vmul.f32 %v1479_v31, %v2639_v51 }
 0x1b5   : > { %v1512_v48 = vmul.f32 %v1480_v41, %v2641_v62 }
 0x1b7   : > { %1652 = vmatprep.mubr.f32.mxu1 %v1512_v48 }
 0x1b8   : > { %1653 = vmatmul.mubr.f32.gmra.mrb[4].mxu1 %v1511_v44 }
 0x1ba   : > { %v2089_v45 = vpop.eup %2088 }
 0x1bb   : > { %v2091_v14 = vpop.eup %2090  ;;  %v1481_v2 = vmul.f32 %v2089_v45, %v1207_v28 }
 0x1bc   : > { %v1482_v49 = vmul.f32 %v2091_v14, %v1209_v0 }
 0x1bd   : > { %v2093_v36 = vpop.eup %2092  ;;  %v1218_v42 = vpop.f32.mrb[10].mxu0  ;;  %v1513_v37 = vmul.f32 %v1481_v2, %v2665_v46 }
 0x1be   : > { %v2095_v12 = vpop.eup %2094  ;;  %v1387_v52 = vadd.f32 1.0, %v2093_v36  ;;  %v1219_v54 = vadd.f32 %v1218_v42, %v3023_v5  ;;  %v1220_v57 = vpop.f32.mrb[11].mxu0  ;;  %v1514_v56 = vmul.f32 %v1482_v49, %v2663_v35 }
 0x1bf   : > { %v1388_v51 = vadd.f32 1.0, %v2095_v12  ;;  %v1221_v62 = vadd.f32 %v1220_v57, %v3026_v19 }
 0x1c0   : > { %2096 = vrcp.f32 %v1387_v52  ;;  %v1828_v26 = vmul.f32 -1.442695, %v1219_v54  ;;  %1657 = vmatprep.mubr.f32.mxu1 %v1514_v56 }
 0x1c1   : > { %2098 = vrcp.f32 %v1388_v51  ;;  %v1829_v28 = vmul.f32 -1.442695, %v1221_v62  ;;  %v1224_v0 = vpop.f32.mrb[12].mxu0  ;;  %1658 = vmatmul.mubr.f32.gmra.mrb[6].mxu1 %v1513_v37 }
 0x1c2   : > { %2100 = vpow2.f32 %v1828_v26  ;;  %v1225_v46 = vadd.f32 %v1224_v0, %v3023_v5  ;;  %v1226_v15 = vpop.f32.mrb[13].mxu0 }
 0x1c3   : > { %2102 = vpow2.f32 %v1829_v28  ;;  %v1227_v50 = vadd.f32 %v1226_v15, %v3026_v19 }
 0x1c4   : > { %v1830_v6 = vmul.f32 -1.442695, %v1225_v46 }
 0x1c5   : > { %v1831_v38 = vmul.f32 -1.442695, %v1227_v50 }
 0x1c6   : > { %2104 = vpow2.f32 %v1830_v6 }
 0x1c7   : > { %2106 = vpow2.f32 %v1831_v38 }
 0x1ca   : > { %v2097_v35 = vpop.eup %2096 }
 0x1cb   : > { %v2099_v33 = vpop.eup %2098  ;;  %v1483_v39 = vmul.f32 %v2097_v35, %v1213_v61 }
 0x1cc   : > { %v2101_v11 = vpop.eup %2100  ;;  %v1484_v60 = vmul.f32 %v2099_v33, %v1215_v43 }
 0x1cd   : > { %v2103_v16 = vpop.eup %2102  ;;  %v1389_v22 = vadd.f32 1.0, %v2101_v11  ;;  %v1515_v58 = vmul.f32 %v1483_v39, %v2690_v1 }
 0x1ce   : > { %v1390_v30 = vadd.f32 1.0, %v2103_v16  ;;  %v1516_v4 = vmul.f32 %v1484_v60, %v2692_v47 }
 0x1cf   : > { %2108 = vrcp.f32 %v1389_v22 }
 0x1d0   : > { %v2105_v23 = vpop.eup %2104  ;;  %2110 = vrcp.f32 %v1390_v30  ;;  %1662 = vmatprep.mubr.f32.mxu1 %v1516_v4 }
 0x1d1   : > { %v2107_v24 = vpop.eup %2106  ;;  %v1391_v31 = vadd.f32 1.0, %v2105_v23  ;;  %1663 = vmatmul.mubr.f32.gmra.mrb[8].mxu1 %v1515_v58 }
 0x1d2   : > { %v1392_v7 = vadd.f32 1.0, %v2107_v24 }
 0x1d3   : > { %2112 = vrcp.f32 %v1391_v31 }
 0x1d4   : > { %2114 = vrcp.f32 %v1392_v7 }
 0x1d6   : > { %v1230_v61 = vpop.f32.mrb[14].mxu0 }
 0x1d7   : > { %v1231_v43 = vadd.f32 %v1230_v61, %v3023_v5  ;;  %v1232_v41 = vpop.f32.mrb[15].mxu0 }
 0x1d8   : > { %v1233_v44 = vadd.f32 %v1232_v41, %v3026_v19 }
 0x1d9   : > { %v2109_v1 = vpop.eup %2108  ;;  %v1832_v48 = vmul.f32 -1.442695, %v1231_v43 }
 0x1da   : > { %v2111_v45 = vpop.eup %2110  ;;  %v1485_v47 = vmul.f32 %v2109_v1, %v1219_v54  ;;  %v1833_v14 = vmul.f32 -1.442695, %v1233_v44 }
 0x1db   : > { %v1486_v2 = vmul.f32 %v2111_v45, %v1221_v62  ;;  %2116 = vpow2.f32 %v1832_v48 }
 0x1dc   : > { %2118 = vpow2.f32 %v1833_v14  ;;  %v1517_v49 = vmul.f32 %v1485_v47, %v2730_v29 }
 0x1dd   : > { %v2113_v36 = vpop.eup %2112  ;;  %v1518_v42 = vmul.f32 %v1486_v2, %v2732_v18 }
 0x1de   : > { %v2115_v37 = vpop.eup %2114  ;;  %v1487_v12 = vmul.f32 %v2113_v36, %v1225_v46 }
 0x1df   : > { %v1488_v52 = vmul.f32 %v2115_v37, %v1227_v50  ;;  %1667 = vmatprep.mubr.f32.mxu1 %v1518_v42 }
 0x1e0   : > { %1668 = vmatmul.mubr.f32.gmra.mrb[10].mxu1 %v1517_v49  ;;  %v1519_v57 = vmul.f32 %v1487_v12, %v2725_v53 }
 0x1e1   : > { %v1520_v56 = vmul.f32 %v1488_v52, %v2727_v55 }
 0x1e3   : > { %1672 = vmatprep.mubr.f32.mxu1 %v1520_v56 }
 0x1e4   : > { %1673 = vmatmul.mubr.f32.gmra.mrb[12].mxu1 %v1519_v57  ;;  %v3153_v57 = vld [vmem:[#allocation2_spill] sm:$0xff] }
 0x1e5   : > { %v2117_v54 = vpop.eup %2116  ;;  %v1236_v51 = vpop.f32.mrb[16].mxu0 }
 0x1e6   : > { %v2119_v62 = vpop.eup %2118  ;;  %v1393_v26 = vadd.f32 1.0, %v2117_v54  ;;  %v1237_v29 = vadd.f32 %v1236_v51, %v3023_v5  ;;  %v1238_v28 = vpop.f32.mrb[17].mxu0 }
 0x1e7   : > { %v1394_v0 = vadd.f32 1.0, %v2119_v62  ;;  %v1239_v18 = vadd.f32 %v1238_v28, %v3026_v19 }
 0x1e8   : > { %2120 = vrcp.f32 %v1393_v26  ;;  %v1834_v46 = vmul.f32 -1.442695, %v1237_v29 }
 0x1e9   : > { %2122 = vrcp.f32 %v1394_v0  ;;  %v1835_v15 = vmul.f32 -1.442695, %v1239_v18  ;;  %v1242_v50 = vpop.f32.mrb[18].mxu0 }
 0x1ea   : > { %2124 = vpow2.f32 %v1834_v46  ;;  %v1243_v53 = vadd.f32 %v1242_v50, %v3023_v5  ;;  %v1244_v55 = vpop.f32.mrb[19].mxu0 }
 0x1eb   : > { %2126 = vpow2.f32 %v1835_v15  ;;  %v1245_v6 = vadd.f32 %v1244_v55, %v3026_v19 }
 0x1ec   : > { %v1836_v38 = vmul.f32 -1.442695, %v1243_v53 }
 0x1ed   : > { %v1837_v35 = vmul.f32 -1.442695, %v1245_v6 }
 0x1ee   : > { %2128 = vpow2.f32 %v1836_v38 }
 0x1ef   : > { %2130 = vpow2.f32 %v1837_v35 }
 0x1f2   : > { %v2121_v33 = vpop.eup %2120 }
 0x1f3   : > { %v2123_v39 = vpop.eup %2122  ;;  %v1489_v11 = vmul.f32 %v2121_v33, %v1231_v43 }
 0x1f4   : > { %v2125_v60 = vpop.eup %2124  ;;  %v1490_v16 = vmul.f32 %v2123_v39, %v1233_v44 }
 0x1f5   : > { %v2127_v22 = vpop.eup %2126  ;;  %v1395_v58 = vadd.f32 1.0, %v2125_v60  ;;  %v1521_v30 = vmul.f32 %v1489_v11, %v2756_v21 }
 0x1f6   : > { %v1396_v4 = vadd.f32 1.0, %v2127_v22  ;;  %v1522_v23 = vmul.f32 %v1490_v16, %v2758_v20  ;;  %v3154_v16 = vld [vmem:[#allocation3_spill] sm:$0xff] }
 0x1f7   : > { %2132 = vrcp.f32 %v1395_v58 }
 0x1f8   : > { %v2129_v24 = vpop.eup %2128  ;;  %2134 = vrcp.f32 %v1396_v4  ;;  %1677 = vmatprep.mubr.f32.mxu1 %v1522_v23 }
 0x1f9   : > { %v2131_v31 = vpop.eup %2130  ;;  %v1397_v7 = vadd.f32 1.0, %v2129_v24  ;;  %1678 = vmatmul.mubr.f32.gmra.mrb[14].mxu1 %v1521_v30  ;;  %v3155_v30 = vld [vmem:[#allocation4_spill] sm:$0xff] }
 0x1fa   : > { %v1398_v61 = vadd.f32 1.0, %v2131_v31 }
 0x1fb   : > { %2136 = vrcp.f32 %v1397_v7 }
 0x1fc   : > { %2138 = vrcp.f32 %v1398_v61 }
 0x1fe   : > { %v1248_v43 = vpop.f32.mrb[20].mxu0 }
 0x1ff   : > { %v1249_v41 = vadd.f32 %v1248_v43, %v3023_v5  ;;  %v1250_v44 = vpop.f32.mrb[21].mxu0 }
 0x200   : > { %v1251_v1 = vadd.f32 %v1250_v44, %v3026_v19 }
 0x201   : > { %v2133_v21 = vpop.eup %2132  ;;  %v1838_v48 = vmul.f32 -1.442695, %v1249_v41 }
 0x202   : > { %v2135_v45 = vpop.eup %2134  ;;  %v1491_v20 = vmul.f32 %v2133_v21, %v1237_v29  ;;  %v1839_v47 = vmul.f32 -1.442695, %v1251_v1 }
 0x203   : > { %v1492_v14 = vmul.f32 %v2135_v45, %v1239_v18  ;;  %2140 = vpow2.f32 %v1838_v48 }
 0x204   : > { %2142 = vpow2.f32 %v1839_v47  ;;  %v1523_v2 = vmul.f32 %v1491_v20, %v2805_v40 }
 0x205   : > { %v2137_v49 = vpop.eup %2136  ;;  %v1524_v36 = vmul.f32 %v1492_v14, %v2807_v63 }
 0x206   : > { %v2139_v42 = vpop.eup %2138  ;;  %v1493_v37 = vmul.f32 %v2137_v49, %v1243_v53 }
 0x207   : > { %v1494_v12 = vmul.f32 %v2139_v42, %v1245_v6  ;;  %1682 = vmatprep.mubr.f32.mxu1 %v1524_v36 }
 0x208   : > { %1683 = vmatmul.mubr.f32.gmra.mrb[16].mxu1 %v1523_v2  ;;  %v1525_v52 = vmul.f32 %v1493_v37, %v2794_v32 }
 0x209   : > { %v1526_v56 = vmul.f32 %v1494_v12, %v3153_v57 }
 0x20b   : > { %1687 = vmatprep.mubr.f32.mxu1 %v1526_v56 }
 0x20c   : > { %1688 = vmatmul.mubr.f32.gmra.mrb[18].mxu1 %v1525_v52 }
 0x20d   : > { %v2141_v54 = vpop.eup %2140  ;;  %v1254_v51 = vpop.f32.mrb[22].mxu0 }
 0x20e   : > { %v2143_v62 = vpop.eup %2142  ;;  %v1399_v26 = vadd.f32 1.0, %v2141_v54  ;;  %v1255_v40 = vadd.f32 %v1254_v51, %v3023_v5  ;;  %v1256_v29 = vpop.f32.mrb[23].mxu0 }
 0x20f   : > { %v1400_v28 = vadd.f32 1.0, %v2143_v62  ;;  %v1257_v63 = vadd.f32 %v1256_v29, %v3026_v19 }
 0x210   : > { %2144 = vrcp.f32 %v1399_v26  ;;  %v1840_v0 = vmul.f32 -1.442695, %v1255_v40 }
 0x211   : > { %2146 = vrcp.f32 %v1400_v28  ;;  %v1841_v18 = vmul.f32 -1.442695, %v1257_v63  ;;  %v1260_v46 = vpop.f32.mrb[24].mxu0 }
 0x212   : > { %2148 = vpow2.f32 %v1840_v0  ;;  %v1261_v32 = vadd.f32 %v1260_v46, %v3023_v5  ;;  %v1262_v15 = vpop.f32.mrb[25].mxu0 }
 0x213   : > { %2150 = vpow2.f32 %v1841_v18  ;;  %v1263_v50 = vadd.f32 %v1262_v15, %v3026_v19 }
 0x214   : > { %v1842_v53 = vmul.f32 -1.442695, %v1261_v32 }
 0x215   : > { %v1843_v55 = vmul.f32 -1.442695, %v1263_v50 }
 0x216   : > { %2152 = vpow2.f32 %v1842_v53 }
 0x217   : > { %2154 = vpow2.f32 %v1843_v55 }
 0x21a   : > { %v2145_v6 = vpop.eup %2144 }
 0x21b   : > { %v2147_v38 = vpop.eup %2146  ;;  %v1495_v35 = vmul.f32 %v2145_v6, %v1249_v41 }
 0x21c   : > { %v2149_v33 = vpop.eup %2148  ;;  %v1496_v39 = vmul.f32 %v2147_v38, %v1251_v1 }
 0x21d   : > { %v2151_v11 = vpop.eup %2150  ;;  %v1401_v60 = vadd.f32 1.0, %v2149_v33  ;;  %v1527_v22 = vmul.f32 %v1495_v35, %v3154_v16 }
 0x21e   : > { %v1402_v58 = vadd.f32 1.0, %v2151_v11  ;;  %v1528_v4 = vmul.f32 %v1496_v39, %v3155_v30 }
 0x21f   : > { %2156 = vrcp.f32 %v1401_v60 }
 0x220   : > { %v2153_v23 = vpop.eup %2152  ;;  %2158 = vrcp.f32 %v1402_v58  ;;  %1692 = vmatprep.mubr.f32.mxu1 %v1528_v4 }
 0x221   : > { %v2155_v24 = vpop.eup %2154  ;;  %v1403_v31 = vadd.f32 1.0, %v2153_v23  ;;  %1693 = vmatmul.mubr.f32.gmra.mrb[20].mxu1 %v1527_v22 }
 0x222   : > { %v1404_v7 = vadd.f32 1.0, %v2155_v24 }
 0x223   : > { %2160 = vrcp.f32 %v1403_v31 }
 0x224   : > { %2162 = vrcp.f32 %v1404_v7 }
 0x226   : > { %v1266_v61 = vpop.f32.mrb[26].mxu0 }
 0x227   : > { %v1267_v43 = vadd.f32 %v1266_v61, %v3023_v5  ;;  %v1268_v41 = vpop.f32.mrb[27].mxu0 }
 0x228   : > { %v1269_v44 = vadd.f32 %v1268_v41, %v3026_v19 }
 0x229   : > { %v2157_v1 = vpop.eup %2156  ;;  %v1844_v21 = vmul.f32 -1.442695, %v1267_v43 }
 0x22a   : > { %v2159_v48 = vpop.eup %2158  ;;  %v1497_v45 = vmul.f32 %v2157_v1, %v1255_v40  ;;  %v1845_v20 = vmul.f32 -1.442695, %v1269_v44 }
 0x22b   : > { %v1498_v47 = vmul.f32 %v2159_v48, %v1257_v63  ;;  %2164 = vpow2.f32 %v1844_v21 }
 0x22c   : > { %2166 = vpow2.f32 %v1845_v20  ;;  %v1529_v14 = vmul.f32 %v1497_v45, %v2959_v8 }
 0x22d   : > { %v2161_v2 = vpop.eup %2160  ;;  %v1530_v49 = vmul.f32 %v1498_v47, %v2961_v25 }
 0x22e   : > { %v2163_v36 = vpop.eup %2162  ;;  %v1499_v42 = vmul.f32 %v2161_v2, %v1261_v32 }
 0x22f   : > { %v1500_v37 = vmul.f32 %v2163_v36, %v1263_v50  ;;  %1697 = vmatprep.mubr.f32.mxu1 %v1530_v49 }
 0x230   : > { %1698 = vmatmul.mubr.f32.gmra.mrb[22].mxu1 %v1529_v14  ;;  %v1531_v12 = vmul.f32 %v1499_v42, %v2957_v27 }
 0x231   : > { %v1532_v52 = vmul.f32 %v1500_v37, %v2955_v59 }
 0x233   : > { %1702 = vmatprep.mubr.f32.mxu1 %v1532_v52 }
 0x234   : > { %1703 = vmatmul.mubr.f32.gmra.mrb[24].mxu1 %v1531_v12 }
 0x235   : > { %v2165_v57 = vpop.eup %2164  ;;  %v1272_v56 = vpop.f32.mrb[28].mxu0 }
 0x236   : > { %v2167_v54 = vpop.eup %2166  ;;  %v1405_v51 = vadd.f32 1.0, %v2165_v57  ;;  %v1273_v8 = vadd.f32 %v1272_v56, %v3023_v5  ;;  %v1274_v62 = vpop.f32.mrb[29].mxu0 }
 0x237   : > { %v1406_v26 = vadd.f32 1.0, %v2167_v54  ;;  %v1275_v25 = vadd.f32 %v1274_v62, %v3026_v19 }
 0x238   : > { %2168 = vrcp.f32 %v1405_v51  ;;  %v1846_v40 = vmul.f32 -1.442695, %v1273_v8 }
 0x239   : > { %2170 = vrcp.f32 %v1406_v26  ;;  %v1847_v29 = vmul.f32 -1.442695, %v1275_v25  ;;  %v1278_v28 = vpop.f32.mrb[30].mxu0 }
 0x23a   : > { %2172 = vpow2.f32 %v1846_v40  ;;  %v1279_v59 = vadd.f32 %v1278_v28, %v3023_v5  ;;  %v1280_v27 = vpop.f32.mrb[31].mxu0 }
 0x23b   : > { %2174 = vpow2.f32 %v1847_v29  ;;  %v1281_v63 = vadd.f32 %v1280_v27, %v3026_v19 }
 0x23c   : > { %v1848_v0 = vmul.f32 -1.442695, %v1279_v59 }
 0x23d   : > { %v1849_v18 = vmul.f32 -1.442695, %v1281_v63 }
 0x23e   : > { %2176 = vpow2.f32 %v1848_v0 }
 0x23f   : > { %2178 = vpow2.f32 %v1849_v18 }
 0x242   : > { %v2169_v46 = vpop.eup %2168 }
 0x243   : > { %v2171_v32 = vpop.eup %2170  ;;  %v1501_v15 = vmul.f32 %v2169_v46, %v1267_v43 }
 0x244   : > { %v2173_v50 = vpop.eup %2172  ;;  %v1502_v53 = vmul.f32 %v2171_v32, %v1269_v44 }
 0x245   : > { %v2175_v55 = vpop.eup %2174  ;;  %v1407_v6 = vadd.f32 1.0, %v2173_v50  ;;  %v1533_v38 = vmul.f32 %v1501_v15, %v2983_v3 }
 0x246   : > { %v1408_v35 = vadd.f32 1.0, %v2175_v55  ;;  %v1534_v5 = vmul.f32 %v1502_v53, %v2985_v34 }
 0x247   : > { %2180 = vrcp.f32 %v1407_v6 }
 0x248   : > { %v2177_v33 = vpop.eup %2176  ;;  %2182 = vrcp.f32 %v1408_v35  ;;  %1707 = vmatprep.mubr.f32.mxu1 %v1534_v5 }
 0x249   : > { %v2179_v19 = vpop.eup %2178  ;;  %v1409_v39 = vadd.f32 1.0, %v2177_v33  ;;  %1708 = vmatmul.mubr.f32.gmra.mrb[26].mxu1 %v1533_v38 }
 0x24a   : > { %v1410_v11 = vadd.f32 1.0, %v2179_v19 }
 0x24b   : > { %2184 = vrcp.f32 %v1409_v39 }
 0x24c   : > { %2186 = vrcp.f32 %v1410_v11 }
 0x251   : > { %v2181_v60 = vpop.eup %2180 }
 0x252   : > { %v2183_v16 = vpop.eup %2182  ;;  %v1503_v22 = vmul.f32 %v2181_v60, %v1273_v8 }
 0x253   : > { %v1504_v58 = vmul.f32 %v2183_v16, %v1275_v25 }
 0x254   : > { %v1535_v30 = vmul.f32 %v1503_v22, %v3006_v10  ;;  %v3095_v10 = vld [vmem:[%s3145_s7] ss:$0 sm:$0xff] }
 0x255   : > { %v2185_v3 = vpop.eup %2184  ;;  %v1536_v34 = vmul.f32 %v1504_v58, %v3008_v17 }
 0x256   : > { %v2187_v4 = vpop.eup %2186  ;;  %v1505_v23 = vmul.f32 %v2185_v3, %v1279_v59 }
 0x257   : > { %v1506_v24 = vmul.f32 %v2187_v4, %v1281_v63  ;;  %1712 = vmatprep.mubr.f32.mxu1 %v1536_v34 }
 0x258   : > { %1713 = vmatmul.mubr.f32.gmra.mrb[28].mxu1 %v1535_v30  ;;  %v1537_v31 = vmul.f32 %v1505_v23, %v3014_v9 }
 0x259   : > { %v1538_v7 = vmul.f32 %v1506_v24, %v3016_v13 }
 0x25b   : > { %1717 = vmatprep.mubr.f32.mxu1 %v1538_v7 }
 0x25c   : > { %1718 = vmatmul.mubr.f32.gmra.mrb[30].mxu1 %v1537_v31 }
 0x281   : > { %v1885_v61 = vpop.f32.mrb[0].mxu1 }
 0x282   : > { %v1886_v43 = vpop.f32.mrb[1].mxu1 }
 0x283   : > { %v1887_v41 = vadd.f32 %v1886_v43, %v1885_v61 }
 0x285   : > { %v1645_v17 = vadd.f32 %v1887_v41, %v3095_v10  ;;  %v1888_v9 = vpop.f32.mrb[2].mxu1 }
 0x286   : > { %v1889_v13 = vpop.f32.mrb[3].mxu1 }
 0x287   : > { %1723 = vst [vmem:[%s3101_s18] sm:$0xff] %v1645_v17  ;;  %v1890_v44 = vadd.f32 %v1889_v13, %v1888_v9 }
 0x289   : > { %v1650_v1 = vadd.f32 %v1890_v44, %v3095_v10 }
 0x28b   : > { %1724 = vst [vmem:[%s3101_s18 + $0x8] sm:$0xff] %v1650_v1  ;;  %v1891_v21 = vpop.f32.mrb[4].mxu1 }
 0x28c   : > { %v1892_v48 = vpop.f32.mrb[5].mxu1 }
 0x28d   : > { %v1893_v45 = vadd.f32 %v1892_v48, %v1891_v21 }
 0x28f   : > { %v1655_v20 = vadd.f32 %v1893_v45, %v3095_v10 }
 0x291   : > { %1725 = vst [vmem:[%s3101_s18 + $0x10] sm:$0xff] %v1655_v20 }
 0x294   : > { %v1894_v47 = vpop.f32.mrb[6].mxu1 }
 0x295   : > { %v1895_v14 = vpop.f32.mrb[7].mxu1 }
 0x296   : > { %v1896_v2 = vadd.f32 %v1895_v14, %v1894_v47 }
 0x298   : > { %v1660_v49 = vadd.f32 %v1896_v2, %v3095_v10 }
 0x29a   : > { %1726 = vst [vmem:[%s3101_s18 + $0x18] sm:$0xff] %v1660_v49 }
 0x2a4   : > { %v1897_v36 = vpop.f32.mrb[8].mxu1 }
 0x2a5   : > { %v1898_v42 = vpop.f32.mrb[9].mxu1 }
 0x2a6   : > { %v1899_v37 = vadd.f32 %v1898_v42, %v1897_v36 }
 0x2a8   : > { %v1665_v12 = vadd.f32 %v1899_v37, %v3095_v10 }
 0x2aa   : > { %1727 = vst [vmem:[%s3101_s18 + $0x20] sm:$0xff] %v1665_v12 }
 0x2b3   : > { %v1900_v52 = vpop.f32.mrb[10].mxu1 }
 0x2b4   : > { %v1901_v57 = vpop.f32.mrb[11].mxu1 }
 0x2b5   : > { %v1902_v56 = vadd.f32 %v1901_v57, %v1900_v52 }
 0x2b7   : > { %v1670_v54 = vadd.f32 %v1902_v56, %v3095_v10  ;;  %v1903_v51 = vpop.f32.mrb[12].mxu1 }
 0x2b8   : > { %v1904_v8 = vpop.f32.mrb[13].mxu1 }
 0x2b9   : > { %1728 = vst [vmem:[%s3101_s18 + $0x28] sm:$0xff] %v1670_v54  ;;  %v1905_v62 = vadd.f32 %v1904_v8, %v1903_v51 }
 0x2bb   : > { %v1675_v26 = vadd.f32 %v1905_v62, %v3095_v10 }
 0x2bd   : > { %1729 = vst [vmem:[%s3101_s18 + $0x30] sm:$0xff] %v1675_v26 }
 0x2cc   : > { %v1906_v25 = vpop.f32.mrb[14].mxu1 }
 0x2cd   : > { %v1907_v40 = vpop.f32.mrb[15].mxu1 }
 0x2ce   : > { %v1908_v29 = vadd.f32 %v1907_v40, %v1906_v25 }
 0x2d0   : > { %v1680_v28 = vadd.f32 %v1908_v29, %v3095_v10 }
 0x2d2   : > { %1730 = vst [vmem:[%s3101_s18 + $0x38] sm:$0xff] %v1680_v28 }
 0x2db   : > { %v1909_v59 = vpop.f32.mrb[16].mxu1 }
 0x2dc   : > { %v1910_v27 = vpop.f32.mrb[17].mxu1 }
 0x2dd   : > { %v1911_v63 = vadd.f32 %v1910_v27, %v1909_v59 }
 0x2df   : > { %v1685_v0 = vadd.f32 %v1911_v63, %v3095_v10  ;;  %v1912_v18 = vpop.f32.mrb[18].mxu1 }
 0x2e0   : > { %v1913_v46 = vpop.f32.mrb[19].mxu1 }
 0x2e1   : > { %1731 = vst [vmem:[%s3101_s18 + $0x40] sm:$0xff] %v1685_v0  ;;  %v1914_v32 = vadd.f32 %v1913_v46, %v1912_v18 }
 0x2e3   : > { %v1690_v15 = vadd.f32 %v1914_v32, %v3095_v10 }
 0x2e5   : > { %1732 = vst [vmem:[%s3101_s18 + $0x48] sm:$0xff] %v1690_v15 }
 0x2f4   : > { %v1915_v50 = vpop.f32.mrb[20].mxu1 }
 0x2f5   : > { %v1916_v53 = vpop.f32.mrb[21].mxu1 }
 0x2f6   : > { %v1917_v55 = vadd.f32 %v1916_v53, %v1915_v50 }
 0x2f8   : > { %v1695_v6 = vadd.f32 %v1917_v55, %v3095_v10 }
 0x2fa   : > { %1733 = vst [vmem:[%s3101_s18 + $0x50] sm:$0xff] %v1695_v6 }
 0x303   : > { %v1918_v38 = vpop.f32.mrb[22].mxu1 }
 0x304   : > { %v1919_v35 = vpop.f32.mrb[23].mxu1 }
 0x305   : > { %v1920_v5 = vadd.f32 %v1919_v35, %v1918_v38 }
 0x307   : > { %v1700_v33 = vadd.f32 %v1920_v5, %v3095_v10  ;;  %v1921_v19 = vpop.f32.mrb[24].mxu1 }
 0x308   : > { %v1922_v39 = vpop.f32.mrb[25].mxu1 }
 0x309   : > { %1734 = vst [vmem:[%s3101_s18 + $0x58] sm:$0xff] %v1700_v33  ;;  %v1923_v11 = vadd.f32 %v1922_v39, %v1921_v19 }
 0x30b   : > { %v1705_v60 = vadd.f32 %v1923_v11, %v3095_v10 }
 0x30d   : > { %1735 = vst [vmem:[%s3101_s18 + $0x60] sm:$0xff] %v1705_v60 }
 0x31c   : > { %v1924_v16 = vpop.f32.mrb[26].mxu1 }
 0x31d   : > { %v1925_v22 = vpop.f32.mrb[27].mxu1 }
 0x31e   : > { %v1926_v58 = vadd.f32 %v1925_v22, %v1924_v16 }
 0x320   : > { %v1710_v30 = vadd.f32 %v1926_v58, %v3095_v10 }
 0x322   : > { %1736 = vst [vmem:[%s3101_s18 + $0x68] sm:$0xff] %v1710_v30 }
 0x32b   : > { %v1927_v3 = vpop.f32.mrb[28].mxu1 }
 0x32c   : > { %v1928_v34 = vpop.f32.mrb[29].mxu1 }
 0x32d   : > { %v1929_v4 = vadd.f32 %v1928_v34, %v1927_v3 }
 0x32f   : > { %v1715_v23 = vadd.f32 %v1929_v4, %v3095_v10  ;;  %v1930_v24 = vpop.f32.mrb[30].mxu1 }
 0x330   : > { %v1931_v31 = vpop.f32.mrb[31].mxu1 }
 0x331   : > { %1737 = vst [vmem:[%s3101_s18 + $0x70] sm:$0xff] %v1715_v23  ;;  %v1932_v7 = vadd.f32 %v1931_v31, %v1930_v24 }
 0x333   : > { %v1720_v61 = vadd.f32 %v1932_v7, %v3095_v10 }
 0x335   : > { %1738 = vst [vmem:[%s3101_s18 + $0x78] sm:$0xff] %v1720_v61 }
 0x336 PF: > { %s18_s27 = sadd.s32 1, %s2194_s27  }
 0x337   : > { %p15_p4 = scmp.ge.s32.totalorder %s18_s27, 4  }
 0x339   :  { %17 = sbr.rel (!%p15_p4) target bundleno = 1 (0x1), region = 85 }

</bundles_post_ra>
